<compile_context>
chip_gen: v6e
topology: v6e:2x2x1
jax: 0.10.0
libtpu: 0.0.40
codegen_flags: <defaults>
</compile_context>

<pallas_src>
import math

import jax
import jax.numpy as jnp
import numpy as np
from jax.experimental import pallas as pl
from jax.experimental.pallas import tpu as pltpu

# ---------------- config (small, consistent with the module's forward) ------
N = 2            # batch (number of prompts)
L = 8            # context length (sequence)
D = 32           # transformer width
H = 4            # attention heads
HD = D // H      # head dim
FF = 4 * D       # MLP hidden dim
E = 16           # text embedding dim (text_projection output)
NUM_LAYERS = 2   # transformer depth
EPS = 1e-5       # LayerNorm eps (PyTorch default)


def _ln(x, w, b):
    """LayerNorm over the last axis (matches nn.LayerNorm semantics)."""
    mu = jnp.mean(x, axis=-1, keepdims=True)
    var = jnp.mean(jnp.square(x - mu), axis=-1, keepdims=True)
    return (x - mu) * jax.lax.rsqrt(var + EPS) * w + b


# ---------------- the single fused kernel ------------------------------------
def _text_encoder_kernel(eot_ref,                       # scalar prefetch (N,) in SMEM
                         prompts_ref, pos_ref, mask_ref,
                         ln1w_ref, ln1b_ref, wqkv_ref, bqkv_ref,
                         wout_ref, bout_ref, ln2w_ref, ln2b_ref,
                         wfc_ref, bfc_ref, wproj_ref, bproj_ref,
                         lnfw_ref, lnfb_ref, proj_ref,
                         o_ref):
    scale = 1.0 / math.sqrt(HD)
    mask = mask_ref[...]                                # (L, L) additive causal mask

    # ---- x = prompts + positional embedding; fold batch into matmul rows ----
    x = (prompts_ref[...].astype(jnp.float32) + pos_ref[...]).reshape(N * L, D)

    # ---- transformer: static unrolled layer loop (weights resident in VMEM) -
    for l in range(NUM_LAYERS):
        # --- pre-LN + multi-head self-attention (causal), residual ---
        h1 = _ln(x, ln1w_ref[l], ln1b_ref[l])
        qkv = jnp.dot(h1, wqkv_ref[l],
                      preferred_element_type=jnp.float32) + bqkv_ref[l]
        q3 = qkv[:, 0 * D:1 * D].reshape(N, L, D)
        k3 = qkv[:, 1 * D:2 * D].reshape(N, L, D)
        v3 = qkv[:, 2 * D:3 * D].reshape(N, L, D)
        wout_l = wout_ref[l]                            # (D, D)

        attn = jnp.zeros((N * L, D), jnp.float32)
        for hh in range(H):                             # static head loop, batched over N
            sl = slice(hh * HD, (hh + 1) * HD)
            s = jnp.einsum('bld,bmd->blm', q3[:, :, sl], k3[:, :, sl],
                           preferred_element_type=jnp.float32) * scale
            s = s + mask                                # broadcast over batch
            s = s - jnp.max(s, axis=-1, keepdims=True)
            p = jnp.exp(s)
            p = p * pl.reciprocal(jnp.sum(p, axis=-1, keepdims=True), approx=True)
            a = jnp.einsum('blm,bmd->bld', p, v3[:, :, sl],
                           preferred_element_type=jnp.float32)
            # fold the concat-over-heads into the output projection (no concat):
            attn = attn + jnp.dot(a.reshape(N * L, HD), wout_l[sl, :],
                                  preferred_element_type=jnp.float32)
        x = x + attn + bout_ref[l]                      # residual 1

        # --- pre-LN + MLP (Linear -> QuickGELU -> Linear), residual ---
        h2 = _ln(x, ln2w_ref[l], ln2b_ref[l])
        m = jnp.dot(h2, wfc_ref[l], preferred_element_type=jnp.float32) + bfc_ref[l]
        m = m * jax.nn.sigmoid(1.702 * m)               # QuickGELU
        m = jnp.dot(m, wproj_ref[l], preferred_element_type=jnp.float32) + bproj_ref[l]
        x = x + m                                       # residual 2

    # ---- vectorized EOT gather on the flattened (N*L, D) activation ---------
    col = jax.lax.broadcasted_iota(jnp.int32, (N, N * L), 1)
    row = jax.lax.broadcasted_iota(jnp.int32, (N, N * L), 0)
    target = row * L
    for n in range(N):                                  # N static; scalars from SMEM
        target = target + jnp.where(row == n, eot_ref[n], 0)
    onehot = (col == target).astype(jnp.float32)        # (N, N*L)
    rows = jnp.dot(onehot, x, preferred_element_type=jnp.float32)      # (N, D)

    # ---- ln_final + text_projection, single store of the (N, E) result ------
    rows = _ln(rows, lnfw_ref[...], lnfb_ref[...])
    out = jnp.dot(rows, proj_ref[...], preferred_element_type=jnp.float32)
    o_ref[...] = out.astype(o_ref.dtype)


# ---------------- TextEncoder.forward ----------------------------------------
def text_encoder_forward(prompts, tokenized_prompts, params):
    # argmax over token ids (EOT position) is cheap indexing glue, done in JAX.
    eot_idx = jnp.argmax(tokenized_prompts, axis=-1).astype(jnp.int32)

    tensor_inputs = [
        prompts, params['pos_emb'], params['mask'],
        params['ln1_w'], params['ln1_b'], params['w_qkv'], params['b_qkv'],
        params['w_out'], params['b_out'], params['ln2_w'], params['ln2_b'],
        params['w_fc'], params['b_fc'], params['w_proj'], params['b_proj'],
        params['lnf_w'], params['lnf_b'], params['text_projection'],
    ]

    def full_spec(a):
        nd = a.ndim
        return pl.BlockSpec(a.shape, lambda i, eot, _nd=nd: (0,) * _nd)

    grid_spec = pltpu.PrefetchScalarGridSpec(
        num_scalar_prefetch=1,
        grid=(1,),
        in_specs=[full_spec(a) for a in tensor_inputs],
        out_specs=pl.BlockSpec((N, E), lambda i, eot: (0, 0)),
    )
    return pl.pallas_call(
        _text_encoder_kernel,
        out_shape=jax.ShapeDtypeStruct((N, E), prompts.dtype),
        grid_spec=grid_spec,
        compiler_params=pltpu.CompilerParams(
            dimension_semantics=("arbitrary",)),   # keep tiny problem on one TC (v7x)
    )(eot_idx, *tensor_inputs)


# ---------------- deterministic parameter init (stacked per-layer weights) ---
def init_params(key):
    keys = jax.random.split(key, 4 + NUM_LAYERS)
    params = {
        'pos_emb': 0.01 * jax.random.normal(keys[0], (L, D), jnp.float32),
        'lnf_w': jnp.ones((1, D), jnp.float32),
        'lnf_b': jnp.zeros((1, D), jnp.float32),
        'text_projection': (D ** -0.5) * jax.random.normal(
            keys[1], (D, E), jnp.float32),
        'mask': jnp.where(jnp.triu(jnp.ones((L, L), jnp.float32), k=1) > 0,
                          -1e9, 0.0).astype(jnp.float32),
        'ln1_w': jnp.ones((NUM_LAYERS, 1, D), jnp.float32),
        'ln1_b': jnp.zeros((NUM_LAYERS, 1, D), jnp.float32),
        'ln2_w': jnp.ones((NUM_LAYERS, 1, D), jnp.float32),
        'ln2_b': jnp.zeros((NUM_LAYERS, 1, D), jnp.float32),
    }
    w_qkv, b_qkv, w_out, b_out, w_fc, b_fc, w_proj, b_proj = ([] for _ in range(8))
    for l in range(NUM_LAYERS):
        lk = jax.random.split(keys[4 + l], 8)
        w_qkv.append(0.05 * jax.random.normal(lk[0], (D, 3 * D), jnp.float32))
        b_qkv.append(0.01 * jax.random.normal(lk[1], (1, 3 * D), jnp.float32))
        w_out.append(0.05 * jax.random.normal(lk[2], (D, D), jnp.float32))
        b_out.append(0.01 * jax.random.normal(lk[3], (1, D), jnp.float32))
        w_fc.append(0.05 * jax.random.normal(lk[4], (D, FF), jnp.float32))
        b_fc.append(0.01 * jax.random.normal(lk[5], (1, FF), jnp.float32))
        w_proj.append(0.05 * jax.random.normal(lk[6], (FF, D), jnp.float32))
        b_proj.append(0.01 * jax.random.normal(lk[7], (1, D), jnp.float32))
    params['w_qkv'] = jnp.stack(w_qkv)
    params['b_qkv'] = jnp.stack(b_qkv)
    params['w_out'] = jnp.stack(w_out)
    params['b_out'] = jnp.stack(b_out)
    params['w_fc'] = jnp.stack(w_fc)
    params['b_fc'] = jnp.stack(b_fc)
    params['w_proj'] = jnp.stack(w_proj)
    params['b_proj'] = jnp.stack(b_proj)
    return params


# ---------------- pure-JAX reference for verification ------------------------
def _ref_block(x, params, l, mask):
    def ln(t, w, b):
        mu = t.mean(-1, keepdims=True)
        var = ((t - mu) ** 2).mean(-1, keepdims=True)
        return (t - mu) / jnp.sqrt(var + EPS) * w + b
    h = ln(x, params['ln1_w'][l, 0], params['ln1_b'][l, 0])
    qkv = h @ params['w_qkv'][l] + params['b_qkv'][l, 0]
    q, k, v = jnp.split(qkv, 3, axis=-1)
    q = q.reshape(N, L, H, HD)
    k = k.reshape(N, L, H, HD)
    v = v.reshape(N, L, H, HD)
    s = jnp.einsum('nlhd,nmhd->nhlm', q, k) / math.sqrt(HD) + mask
    p = jax.nn.softmax(s, axis=-1)
    a = jnp.einsum('nhlm,nmhd->nlhd', p, v).reshape(N, L, D)
    a = a @ params['w_out'][l] + params['b_out'][l, 0]
    x1 = x + a
    h2 = ln(x1, params['ln2_w'][l, 0], params['ln2_b'][l, 0])
    m = h2 @ params['w_fc'][l] + params['b_fc'][l, 0]
    m = m * jax.nn.sigmoid(1.702 * m)
    m = m @ params['w_proj'][l] + params['b_proj'][l, 0]
    return x1 + m


def reference_forward(prompts, tokens, params):
    x = prompts + params['pos_emb']
    for l in range(NUM_LAYERS):
        x = _ref_block(x, params, l, params['mask'])
    mu = x.mean(-1, keepdims=True)
    var = ((x - mu) ** 2).mean(-1, keepdims=True)
    x = (x - mu) / jnp.sqrt(var + EPS) * params['lnf_w'][0] + params['lnf_b'][0]
    eot = jnp.argmax(tokens, axis=-1)
    return x[jnp.arange(N), eot] @ params['text_projection']


if __name__ == "__main__":
    key = jax.random.PRNGKey(0)
    kp, kt, kparams = jax.random.split(key, 3)
    params = init_params(kparams)

    prompts = 0.1 * jax.random.normal(kp, (N, L, D), jnp.float32)
    tokens = jax.random.randint(kt, (N, L), 1, 400).astype(jnp.int32)
    # place a distinct EOT (max token id) per prompt, like CLIP tokenization
    eot_positions = jnp.array([5, L - 1], dtype=jnp.int32)
    tokens = tokens.at[jnp.arange(N), eot_positions].set(49407)

    out = text_encoder_forward(prompts, tokens, params)
    out = jax.block_until_ready(out)

    ref = reference_forward(prompts, tokens, params)
    assert out.shape == (N, E)
    np.testing.assert_allclose(np.asarray(out), np.asarray(ref),
                               atol=2e-2, rtol=2e-2)
    print("KERNEL_OK")
</pallas_src>

<mosaic_0001>
module attributes {stable_mosaic.version = 11 : i64} {
  func.func @_text_encoder_kernel(%arg0: i32, %arg1: memref<2xi32, #tpu.memory_space<smem>>, %arg2: memref<2x8x32xf32, #tpu.memory_space<vmem>>, %arg3: memref<8x32xf32, #tpu.memory_space<vmem>>, %arg4: memref<8x8xf32, #tpu.memory_space<vmem>>, %arg5: memref<2x1x32xf32, #tpu.memory_space<vmem>>, %arg6: memref<2x1x32xf32, #tpu.memory_space<vmem>>, %arg7: memref<2x32x96xf32, #tpu.memory_space<vmem>>, %arg8: memref<2x1x96xf32, #tpu.memory_space<vmem>>, %arg9: memref<2x32x32xf32, #tpu.memory_space<vmem>>, %arg10: memref<2x1x32xf32, #tpu.memory_space<vmem>>, %arg11: memref<2x1x32xf32, #tpu.memory_space<vmem>>, %arg12: memref<2x1x32xf32, #tpu.memory_space<vmem>>, %arg13: memref<2x32x128xf32, #tpu.memory_space<vmem>>, %arg14: memref<2x1x128xf32, #tpu.memory_space<vmem>>, %arg15: memref<2x128x32xf32, #tpu.memory_space<vmem>>, %arg16: memref<2x1x32xf32, #tpu.memory_space<vmem>>, %arg17: memref<1x32xf32, #tpu.memory_space<vmem>>, %arg18: memref<1x32xf32, #tpu.memory_space<vmem>>, %arg19: memref<32x16xf32, #tpu.memory_space<vmem>>, %arg20: memref<2x16xf32, #tpu.memory_space<vmem>>) attributes {dimension_semantics = [#tpu.dimension_semantics<arbitrary>], iteration_bounds = array<i64: 1>, scalar_prefetch = 1 : i64, scratch_operands = 0 : i64, tpu.core_type = #tpu.core_type<tc>, window_params = [{pipeline_mode = #tpu.pipeline_mode<synchronous>, transform_indices = @transform_0, window_bounds = array<i64: 2, 8, 32>}, {pipeline_mode = #tpu.pipeline_mode<synchronous>, transform_indices = @transform_1, window_bounds = array<i64: 8, 32>}, {pipeline_mode = #tpu.pipeline_mode<synchronous>, transform_indices = @transform_2, window_bounds = array<i64: 8, 8>}, {pipeline_mode = #tpu.pipeline_mode<synchronous>, transform_indices = @transform_3, window_bounds = array<i64: 2, 1, 32>}, {pipeline_mode = #tpu.pipeline_mode<synchronous>, transform_indices = @transform_4, window_bounds = array<i64: 2, 1, 32>}, {pipeline_mode = #tpu.pipeline_mode<synchronous>, transform_indices = @transform_5, window_bounds = array<i64: 2, 32, 96>}, {pipeline_mode = #tpu.pipeline_mode<synchronous>, transform_indices = @transform_6, window_bounds = array<i64: 2, 1, 96>}, {pipeline_mode = #tpu.pipeline_mode<synchronous>, transform_indices = @transform_7, window_bounds = array<i64: 2, 32, 32>}, {pipeline_mode = #tpu.pipeline_mode<synchronous>, transform_indices = @transform_8, window_bounds = array<i64: 2, 1, 32>}, {pipeline_mode = #tpu.pipeline_mode<synchronous>, transform_indices = @transform_9, window_bounds = array<i64: 2, 1, 32>}, {pipeline_mode = #tpu.pipeline_mode<synchronous>, transform_indices = @transform_10, window_bounds = array<i64: 2, 1, 32>}, {pipeline_mode = #tpu.pipeline_mode<synchronous>, transform_indices = @transform_11, window_bounds = array<i64: 2, 32, 128>}, {pipeline_mode = #tpu.pipeline_mode<synchronous>, transform_indices = @transform_12, window_bounds = array<i64: 2, 1, 128>}, {pipeline_mode = #tpu.pipeline_mode<synchronous>, transform_indices = @transform_13, window_bounds = array<i64: 2, 128, 32>}, {pipeline_mode = #tpu.pipeline_mode<synchronous>, transform_indices = @transform_14, window_bounds = array<i64: 2, 1, 32>}, {pipeline_mode = #tpu.pipeline_mode<synchronous>, transform_indices = @transform_15, window_bounds = array<i64: 1, 32>}, {pipeline_mode = #tpu.pipeline_mode<synchronous>, transform_indices = @transform_16, window_bounds = array<i64: 1, 32>}, {pipeline_mode = #tpu.pipeline_mode<synchronous>, transform_indices = @transform_17, window_bounds = array<i64: 32, 16>}, {pipeline_mode = #tpu.pipeline_mode<synchronous>, transform_indices = @transform_18, window_bounds = array<i64: 2, 16>}]} {
    %c0 = arith.constant 0 : index
    %c0_0 = arith.constant 0 : index
    %0 = vector.load %arg4[%c0, %c0_0] : memref<8x8xf32, #tpu.memory_space<vmem>>, vector<8x8xf32>
    %c0_1 = arith.constant 0 : index
    %c0_2 = arith.constant 0 : index
    %c0_3 = arith.constant 0 : index
    %1 = vector.load %arg2[%c0_1, %c0_2, %c0_3] : memref<2x8x32xf32, #tpu.memory_space<vmem>>, vector<2x8x32xf32>
    %c0_4 = arith.constant 0 : index
    %c0_5 = arith.constant 0 : index
    %2 = vector.load %arg3[%c0_4, %c0_5] : memref<8x32xf32, #tpu.memory_space<vmem>>, vector<8x32xf32>
    %3 = vector.shape_cast %2 : vector<8x32xf32> to vector<1x8x32xf32>
    %4 = vector.broadcast %3 : vector<1x8x32xf32> to vector<2x8x32xf32>
    %5 = arith.addf %1, %4 : vector<2x8x32xf32>
    %6 = vector.shape_cast %5 : vector<2x8x32xf32> to vector<16x32xf32>
    %c0_6 = arith.constant 0 : index
    %c0_7 = arith.constant 0 : index
    %c0_8 = arith.constant 0 : index
    %7 = vector.load %arg5[%c0_6, %c0_7, %c0_8] : memref<2x1x32xf32, #tpu.memory_space<vmem>>, vector<1x1x32xf32>
    %8 = vector.shape_cast %7 : vector<1x1x32xf32> to vector<1x32xf32>
    %c0_9 = arith.constant 0 : index
    %c0_10 = arith.constant 0 : index
    %c0_11 = arith.constant 0 : index
    %9 = vector.load %arg6[%c0_9, %c0_10, %c0_11] : memref<2x1x32xf32, #tpu.memory_space<vmem>>, vector<1x1x32xf32>
    %10 = vector.shape_cast %9 : vector<1x1x32xf32> to vector<1x32xf32>
    %cst = arith.constant dense<0.000000e+00> : vector<16xf32>
    %11 = vector.multi_reduction <add>, %6, %cst [1] : vector<16x32xf32> to vector<16xf32>
    %12 = vector.shape_cast %11 : vector<16xf32> to vector<16x1xf32>
    %cst_12 = arith.constant 3.200000e+01 : f32
    %13 = vector.broadcast %cst_12 : f32 to vector<16x1xf32>
    %14 = arith.divf %12, %13 : vector<16x1xf32>
    %15 = vector.broadcast %14 : vector<16x1xf32> to vector<16x32xf32>
    %16 = arith.subf %6, %15 : vector<16x32xf32>
    %17 = arith.mulf %16, %16 : vector<16x32xf32>
    %cst_13 = arith.constant dense<0.000000e+00> : vector<16xf32>
    %18 = vector.multi_reduction <add>, %17, %cst_13 [1] : vector<16x32xf32> to vector<16xf32>
    %19 = vector.shape_cast %18 : vector<16xf32> to vector<16x1xf32>
    %cst_14 = arith.constant 3.200000e+01 : f32
    %20 = vector.broadcast %cst_14 : f32 to vector<16x1xf32>
    %21 = arith.divf %19, %20 : vector<16x1xf32>
    %22 = vector.broadcast %14 : vector<16x1xf32> to vector<16x32xf32>
    %23 = arith.subf %6, %22 : vector<16x32xf32>
    %cst_15 = arith.constant 9.99999974E-6 : f32
    %24 = vector.broadcast %cst_15 : f32 to vector<16x1xf32>
    %25 = arith.addf %21, %24 : vector<16x1xf32>
    %26 = math.rsqrt %25 : vector<16x1xf32>
    %27 = vector.broadcast %26 : vector<16x1xf32> to vector<16x32xf32>
    %28 = arith.mulf %23, %27 : vector<16x32xf32>
    %29 = vector.broadcast %8 : vector<1x32xf32> to vector<16x32xf32>
    %30 = arith.mulf %28, %29 : vector<16x32xf32>
    %31 = vector.broadcast %10 : vector<1x32xf32> to vector<16x32xf32>
    %32 = arith.addf %30, %31 : vector<16x32xf32>
    %c0_16 = arith.constant 0 : index
    %c0_17 = arith.constant 0 : index
    %c0_18 = arith.constant 0 : index
    %33 = vector.load %arg7[%c0_16, %c0_17, %c0_18] : memref<2x32x96xf32, #tpu.memory_space<vmem>>, vector<1x32x96xf32>
    %34 = vector.shape_cast %33 : vector<1x32x96xf32> to vector<32x96xf32>
    %cst_19 = arith.constant dense<0.000000e+00> : vector<16x96xf32>
    %35 = tpu.matmul %32, %34, %cst_19 {dimension_numbers = #tpu.dot_dimension_numbers<[1], [0], [0], [1], [0, 0, 1, 1], [], []>} : vector<16x32xf32>, vector<32x96xf32>, vector<16x96xf32> -> vector<16x96xf32>
    %c0_20 = arith.constant 0 : index
    %c0_21 = arith.constant 0 : index
    %c0_22 = arith.constant 0 : index
    %36 = vector.load %arg8[%c0_20, %c0_21, %c0_22] : memref<2x1x96xf32, #tpu.memory_space<vmem>>, vector<1x1x96xf32>
    %37 = vector.shape_cast %36 : vector<1x1x96xf32> to vector<1x96xf32>
    %38 = vector.broadcast %37 : vector<1x96xf32> to vector<16x96xf32>
    %39 = arith.addf %35, %38 : vector<16x96xf32>
    %40 = vector.extract_strided_slice %39 {offsets = [0, 0], sizes = [16, 32], strides = [1, 1]} : vector<16x96xf32> to vector<16x32xf32>
    %41 = vector.shape_cast %40 : vector<16x32xf32> to vector<2x8x32xf32>
    %42 = vector.extract_strided_slice %39 {offsets = [0, 32], sizes = [16, 32], strides = [1, 1]} : vector<16x96xf32> to vector<16x32xf32>
    %43 = vector.shape_cast %42 : vector<16x32xf32> to vector<2x8x32xf32>
    %44 = vector.extract_strided_slice %39 {offsets = [0, 64], sizes = [16, 32], strides = [1, 1]} : vector<16x96xf32> to vector<16x32xf32>
    %45 = vector.shape_cast %44 : vector<16x32xf32> to vector<2x8x32xf32>
    %c0_23 = arith.constant 0 : index
    %c0_24 = arith.constant 0 : index
    %c0_25 = arith.constant 0 : index
    %46 = vector.load %arg9[%c0_23, %c0_24, %c0_25] : memref<2x32x32xf32, #tpu.memory_space<vmem>>, vector<1x32x32xf32>
    %47 = vector.shape_cast %46 : vector<1x32x32xf32> to vector<32x32xf32>
    %cst_26 = arith.constant 0.000000e+00 : f32
    %48 = vector.broadcast %cst_26 : f32 to vector<16x32xf32>
    %49 = vector.extract_strided_slice %41 {offsets = [0, 0, 0], sizes = [2, 8, 8], strides = [1, 1, 1]} : vector<2x8x32xf32> to vector<2x8x8xf32>
    %50 = vector.extract_strided_slice %43 {offsets = [0, 0, 0], sizes = [2, 8, 8], strides = [1, 1, 1]} : vector<2x8x32xf32> to vector<2x8x8xf32>
    "tpu.trace_start"() <{level = 10 : i32, message = "bld,bmd->blm"}> : () -> ()
    %cst_27 = arith.constant dense<0.000000e+00> : vector<2x8x8xf32>
    %51 = tpu.matmul %49, %50, %cst_27 {dimension_numbers = #tpu.dot_dimension_numbers<[2], [2], [1], [1], [0, 0, 0, 1, 1, 1], [0], [0]>} : vector<2x8x8xf32>, vector<2x8x8xf32>, vector<2x8x8xf32> -> vector<2x8x8xf32>
    "tpu.trace_stop"() : () -> ()
    %cst_28 = arith.constant 0.353553385 : f32
    %52 = vector.broadcast %cst_28 : f32 to vector<2x8x8xf32>
    %53 = arith.mulf %51, %52 : vector<2x8x8xf32>
    %54 = vector.shape_cast %0 : vector<8x8xf32> to vector<1x8x8xf32>
    %55 = vector.broadcast %54 : vector<1x8x8xf32> to vector<2x8x8xf32>
    %56 = arith.addf %53, %55 : vector<2x8x8xf32>
    %cst_29 = arith.constant dense<0xFF800000> : vector<2x8xf32>
    %57 = vector.multi_reduction <maximumf>, %56, %cst_29 [2] : vector<2x8x8xf32> to vector<2x8xf32>
    %58 = vector.shape_cast %57 : vector<2x8xf32> to vector<2x8x1xf32>
    %59 = vector.broadcast %58 : vector<2x8x1xf32> to vector<2x8x8xf32>
    %60 = arith.subf %56, %59 : vector<2x8x8xf32>
    %61 = math.exp %60 : vector<2x8x8xf32>
    %cst_30 = arith.constant dense<0.000000e+00> : vector<2x8xf32>
    %62 = vector.multi_reduction <add>, %61, %cst_30 [2] : vector<2x8x8xf32> to vector<2x8xf32>
    %63 = vector.shape_cast %62 : vector<2x8xf32> to vector<2x8x1xf32>
    %64 = tpu.reciprocal %63 {approx = true} : vector<2x8x1xf32> -> vector<2x8x1xf32>
    %65 = vector.broadcast %64 : vector<2x8x1xf32> to vector<2x8x8xf32>
    %66 = arith.mulf %61, %65 : vector<2x8x8xf32>
    %67 = vector.extract_strided_slice %45 {offsets = [0, 0, 0], sizes = [2, 8, 8], strides = [1, 1, 1]} : vector<2x8x32xf32> to vector<2x8x8xf32>
    "tpu.trace_start"() <{level = 10 : i32, message = "blm,bmd->bld"}> : () -> ()
    %cst_31 = arith.constant dense<0.000000e+00> : vector<2x8x8xf32>
    %68 = tpu.matmul %66, %67, %cst_31 {dimension_numbers = #tpu.dot_dimension_numbers<[2], [1], [1], [2], [0, 0, 0, 1, 1, 2], [0], [0]>} : vector<2x8x8xf32>, vector<2x8x8xf32>, vector<2x8x8xf32> -> vector<2x8x8xf32>
    "tpu.trace_stop"() : () -> ()
    %69 = vector.shape_cast %68 : vector<2x8x8xf32> to vector<16x8xf32>
    %70 = vector.extract_strided_slice %47 {offsets = [0, 0], sizes = [8, 32], strides = [1, 1]} : vector<32x32xf32> to vector<8x32xf32>
    %cst_32 = arith.constant dense<0.000000e+00> : vector<16x32xf32>
    %71 = tpu.matmul %69, %70, %cst_32 {dimension_numbers = #tpu.dot_dimension_numbers<[1], [0], [0], [1], [0, 0, 1, 1], [], []>} : vector<16x8xf32>, vector<8x32xf32>, vector<16x32xf32> -> vector<16x32xf32>
    %72 = arith.addf %48, %71 : vector<16x32xf32>
    %73 = vector.extract_strided_slice %41 {offsets = [0, 0, 8], sizes = [2, 8, 8], strides = [1, 1, 1]} : vector<2x8x32xf32> to vector<2x8x8xf32>
    %74 = vector.extract_strided_slice %43 {offsets = [0, 0, 8], sizes = [2, 8, 8], strides = [1, 1, 1]} : vector<2x8x32xf32> to vector<2x8x8xf32>
    "tpu.trace_start"() <{level = 10 : i32, message = "bld,bmd->blm"}> : () -> ()
    %cst_33 = arith.constant dense<0.000000e+00> : vector<2x8x8xf32>
    %75 = tpu.matmul %73, %74, %cst_33 {dimension_numbers = #tpu.dot_dimension_numbers<[2], [2], [1], [1], [0, 0, 0, 1, 1, 1], [0], [0]>} : vector<2x8x8xf32>, vector<2x8x8xf32>, vector<2x8x8xf32> -> vector<2x8x8xf32>
    "tpu.trace_stop"() : () -> ()
    %cst_34 = arith.constant 0.353553385 : f32
    %76 = vector.broadcast %cst_34 : f32 to vector<2x8x8xf32>
    %77 = arith.mulf %75, %76 : vector<2x8x8xf32>
    %78 = vector.shape_cast %0 : vector<8x8xf32> to vector<1x8x8xf32>
    %79 = vector.broadcast %78 : vector<1x8x8xf32> to vector<2x8x8xf32>
    %80 = arith.addf %77, %79 : vector<2x8x8xf32>
    %cst_35 = arith.constant dense<0xFF800000> : vector<2x8xf32>
    %81 = vector.multi_reduction <maximumf>, %80, %cst_35 [2] : vector<2x8x8xf32> to vector<2x8xf32>
    %82 = vector.shape_cast %81 : vector<2x8xf32> to vector<2x8x1xf32>
    %83 = vector.broadcast %82 : vector<2x8x1xf32> to vector<2x8x8xf32>
    %84 = arith.subf %80, %83 : vector<2x8x8xf32>
    %85 = math.exp %84 : vector<2x8x8xf32>
    %cst_36 = arith.constant dense<0.000000e+00> : vector<2x8xf32>
    %86 = vector.multi_reduction <add>, %85, %cst_36 [2] : vector<2x8x8xf32> to vector<2x8xf32>
    %87 = vector.shape_cast %86 : vector<2x8xf32> to vector<2x8x1xf32>
    %88 = tpu.reciprocal %87 {approx = true} : vector<2x8x1xf32> -> vector<2x8x1xf32>
    %89 = vector.broadcast %88 : vector<2x8x1xf32> to vector<2x8x8xf32>
    %90 = arith.mulf %85, %89 : vector<2x8x8xf32>
    %91 = vector.extract_strided_slice %45 {offsets = [0, 0, 8], sizes = [2, 8, 8], strides = [1, 1, 1]} : vector<2x8x32xf32> to vector<2x8x8xf32>
    "tpu.trace_start"() <{level = 10 : i32, message = "blm,bmd->bld"}> : () -> ()
    %cst_37 = arith.constant dense<0.000000e+00> : vector<2x8x8xf32>
    %92 = tpu.matmul %90, %91, %cst_37 {dimension_numbers = #tpu.dot_dimension_numbers<[2], [1], [1], [2], [0, 0, 0, 1, 1, 2], [0], [0]>} : vector<2x8x8xf32>, vector<2x8x8xf32>, vector<2x8x8xf32> -> vector<2x8x8xf32>
    "tpu.trace_stop"() : () -> ()
    %93 = vector.shape_cast %92 : vector<2x8x8xf32> to vector<16x8xf32>
    %94 = vector.extract_strided_slice %47 {offsets = [8, 0], sizes = [8, 32], strides = [1, 1]} : vector<32x32xf32> to vector<8x32xf32>
    %cst_38 = arith.constant dense<0.000000e+00> : vector<16x32xf32>
    %95 = tpu.matmul %93, %94, %cst_38 {dimension_numbers = #tpu.dot_dimension_numbers<[1], [0], [0], [1], [0, 0, 1, 1], [], []>} : vector<16x8xf32>, vector<8x32xf32>, vector<16x32xf32> -> vector<16x32xf32>
    %96 = arith.addf %72, %95 : vector<16x32xf32>
    %97 = vector.extract_strided_slice %41 {offsets = [0, 0, 16], sizes = [2, 8, 8], strides = [1, 1, 1]} : vector<2x8x32xf32> to vector<2x8x8xf32>
    %98 = vector.extract_strided_slice %43 {offsets = [0, 0, 16], sizes = [2, 8, 8], strides = [1, 1, 1]} : vector<2x8x32xf32> to vector<2x8x8xf32>
    "tpu.trace_start"() <{level = 10 : i32, message = "bld,bmd->blm"}> : () -> ()
    %cst_39 = arith.constant dense<0.000000e+00> : vector<2x8x8xf32>
    %99 = tpu.matmul %97, %98, %cst_39 {dimension_numbers = #tpu.dot_dimension_numbers<[2], [2], [1], [1], [0, 0, 0, 1, 1, 1], [0], [0]>} : vector<2x8x8xf32>, vector<2x8x8xf32>, vector<2x8x8xf32> -> vector<2x8x8xf32>
    "tpu.trace_stop"() : () -> ()
    %cst_40 = arith.constant 0.353553385 : f32
    %100 = vector.broadcast %cst_40 : f32 to vector<2x8x8xf32>
    %101 = arith.mulf %99, %100 : vector<2x8x8xf32>
    %102 = vector.shape_cast %0 : vector<8x8xf32> to vector<1x8x8xf32>
    %103 = vector.broadcast %102 : vector<1x8x8xf32> to vector<2x8x8xf32>
    %104 = arith.addf %101, %103 : vector<2x8x8xf32>
    %cst_41 = arith.constant dense<0xFF800000> : vector<2x8xf32>
    %105 = vector.multi_reduction <maximumf>, %104, %cst_41 [2] : vector<2x8x8xf32> to vector<2x8xf32>
    %106 = vector.shape_cast %105 : vector<2x8xf32> to vector<2x8x1xf32>
    %107 = vector.broadcast %106 : vector<2x8x1xf32> to vector<2x8x8xf32>
    %108 = arith.subf %104, %107 : vector<2x8x8xf32>
    %109 = math.exp %108 : vector<2x8x8xf32>
    %cst_42 = arith.constant dense<0.000000e+00> : vector<2x8xf32>
    %110 = vector.multi_reduction <add>, %109, %cst_42 [2] : vector<2x8x8xf32> to vector<2x8xf32>
    %111 = vector.shape_cast %110 : vector<2x8xf32> to vector<2x8x1xf32>
    %112 = tpu.reciprocal %111 {approx = true} : vector<2x8x1xf32> -> vector<2x8x1xf32>
    %113 = vector.broadcast %112 : vector<2x8x1xf32> to vector<2x8x8xf32>
    %114 = arith.mulf %109, %113 : vector<2x8x8xf32>
    %115 = vector.extract_strided_slice %45 {offsets = [0, 0, 16], sizes = [2, 8, 8], strides = [1, 1, 1]} : vector<2x8x32xf32> to vector<2x8x8xf32>
    "tpu.trace_start"() <{level = 10 : i32, message = "blm,bmd->bld"}> : () -> ()
    %cst_43 = arith.constant dense<0.000000e+00> : vector<2x8x8xf32>
    %116 = tpu.matmul %114, %115, %cst_43 {dimension_numbers = #tpu.dot_dimension_numbers<[2], [1], [1], [2], [0, 0, 0, 1, 1, 2], [0], [0]>} : vector<2x8x8xf32>, vector<2x8x8xf32>, vector<2x8x8xf32> -> vector<2x8x8xf32>
    "tpu.trace_stop"() : () -> ()
    %117 = vector.shape_cast %116 : vector<2x8x8xf32> to vector<16x8xf32>
    %118 = vector.extract_strided_slice %47 {offsets = [16, 0], sizes = [8, 32], strides = [1, 1]} : vector<32x32xf32> to vector<8x32xf32>
    %cst_44 = arith.constant dense<0.000000e+00> : vector<16x32xf32>
    %119 = tpu.matmul %117, %118, %cst_44 {dimension_numbers = #tpu.dot_dimension_numbers<[1], [0], [0], [1], [0, 0, 1, 1], [], []>} : vector<16x8xf32>, vector<8x32xf32>, vector<16x32xf32> -> vector<16x32xf32>
    %120 = arith.addf %96, %119 : vector<16x32xf32>
    %121 = vector.extract_strided_slice %41 {offsets = [0, 0, 24], sizes = [2, 8, 8], strides = [1, 1, 1]} : vector<2x8x32xf32> to vector<2x8x8xf32>
    %122 = vector.extract_strided_slice %43 {offsets = [0, 0, 24], sizes = [2, 8, 8], strides = [1, 1, 1]} : vector<2x8x32xf32> to vector<2x8x8xf32>
    "tpu.trace_start"() <{level = 10 : i32, message = "bld,bmd->blm"}> : () -> ()
    %cst_45 = arith.constant dense<0.000000e+00> : vector<2x8x8xf32>
    %123 = tpu.matmul %121, %122, %cst_45 {dimension_numbers = #tpu.dot_dimension_numbers<[2], [2], [1], [1], [0, 0, 0, 1, 1, 1], [0], [0]>} : vector<2x8x8xf32>, vector<2x8x8xf32>, vector<2x8x8xf32> -> vector<2x8x8xf32>
    "tpu.trace_stop"() : () -> ()
    %cst_46 = arith.constant 0.353553385 : f32
    %124 = vector.broadcast %cst_46 : f32 to vector<2x8x8xf32>
    %125 = arith.mulf %123, %124 : vector<2x8x8xf32>
    %126 = vector.shape_cast %0 : vector<8x8xf32> to vector<1x8x8xf32>
    %127 = vector.broadcast %126 : vector<1x8x8xf32> to vector<2x8x8xf32>
    %128 = arith.addf %125, %127 : vector<2x8x8xf32>
    %cst_47 = arith.constant dense<0xFF800000> : vector<2x8xf32>
    %129 = vector.multi_reduction <maximumf>, %128, %cst_47 [2] : vector<2x8x8xf32> to vector<2x8xf32>
    %130 = vector.shape_cast %129 : vector<2x8xf32> to vector<2x8x1xf32>
    %131 = vector.broadcast %130 : vector<2x8x1xf32> to vector<2x8x8xf32>
    %132 = arith.subf %128, %131 : vector<2x8x8xf32>
    %133 = math.exp %132 : vector<2x8x8xf32>
    %cst_48 = arith.constant dense<0.000000e+00> : vector<2x8xf32>
    %134 = vector.multi_reduction <add>, %133, %cst_48 [2] : vector<2x8x8xf32> to vector<2x8xf32>
    %135 = vector.shape_cast %134 : vector<2x8xf32> to vector<2x8x1xf32>
    %136 = tpu.reciprocal %135 {approx = true} : vector<2x8x1xf32> -> vector<2x8x1xf32>
    %137 = vector.broadcast %136 : vector<2x8x1xf32> to vector<2x8x8xf32>
    %138 = arith.mulf %133, %137 : vector<2x8x8xf32>
    %139 = vector.extract_strided_slice %45 {offsets = [0, 0, 24], sizes = [2, 8, 8], strides = [1, 1, 1]} : vector<2x8x32xf32> to vector<2x8x8xf32>
    "tpu.trace_start"() <{level = 10 : i32, message = "blm,bmd->bld"}> : () -> ()
    %cst_49 = arith.constant dense<0.000000e+00> : vector<2x8x8xf32>
    %140 = tpu.matmul %138, %139, %cst_49 {dimension_numbers = #tpu.dot_dimension_numbers<[2], [1], [1], [2], [0, 0, 0, 1, 1, 2], [0], [0]>} : vector<2x8x8xf32>, vector<2x8x8xf32>, vector<2x8x8xf32> -> vector<2x8x8xf32>
    "tpu.trace_stop"() : () -> ()
    %141 = vector.shape_cast %140 : vector<2x8x8xf32> to vector<16x8xf32>
    %142 = vector.extract_strided_slice %47 {offsets = [24, 0], sizes = [8, 32], strides = [1, 1]} : vector<32x32xf32> to vector<8x32xf32>
    %cst_50 = arith.constant dense<0.000000e+00> : vector<16x32xf32>
    %143 = tpu.matmul %141, %142, %cst_50 {dimension_numbers = #tpu.dot_dimension_numbers<[1], [0], [0], [1], [0, 0, 1, 1], [], []>} : vector<16x8xf32>, vector<8x32xf32>, vector<16x32xf32> -> vector<16x32xf32>
    %144 = arith.addf %120, %143 : vector<16x32xf32>
    %145 = arith.addf %6, %144 : vector<16x32xf32>
    %c0_51 = arith.constant 0 : index
    %c0_52 = arith.constant 0 : index
    %c0_53 = arith.constant 0 : index
    %146 = vector.load %arg10[%c0_51, %c0_52, %c0_53] : memref<2x1x32xf32, #tpu.memory_space<vmem>>, vector<1x1x32xf32>
    %147 = vector.shape_cast %146 : vector<1x1x32xf32> to vector<1x32xf32>
    %148 = vector.broadcast %147 : vector<1x32xf32> to vector<16x32xf32>
    %149 = arith.addf %145, %148 : vector<16x32xf32>
    %c0_54 = arith.constant 0 : index
    %c0_55 = arith.constant 0 : index
    %c0_56 = arith.constant 0 : index
    %150 = vector.load %arg11[%c0_54, %c0_55, %c0_56] : memref<2x1x32xf32, #tpu.memory_space<vmem>>, vector<1x1x32xf32>
    %151 = vector.shape_cast %150 : vector<1x1x32xf32> to vector<1x32xf32>
    %c0_57 = arith.constant 0 : index
    %c0_58 = arith.constant 0 : index
    %c0_59 = arith.constant 0 : index
    %152 = vector.load %arg12[%c0_57, %c0_58, %c0_59] : memref<2x1x32xf32, #tpu.memory_space<vmem>>, vector<1x1x32xf32>
    %153 = vector.shape_cast %152 : vector<1x1x32xf32> to vector<1x32xf32>
    %cst_60 = arith.constant dense<0.000000e+00> : vector<16xf32>
    %154 = vector.multi_reduction <add>, %149, %cst_60 [1] : vector<16x32xf32> to vector<16xf32>
    %155 = vector.shape_cast %154 : vector<16xf32> to vector<16x1xf32>
    %cst_61 = arith.constant 3.200000e+01 : f32
    %156 = vector.broadcast %cst_61 : f32 to vector<16x1xf32>
    %157 = arith.divf %155, %156 : vector<16x1xf32>
    %158 = vector.broadcast %157 : vector<16x1xf32> to vector<16x32xf32>
    %159 = arith.subf %149, %158 : vector<16x32xf32>
    %160 = arith.mulf %159, %159 : vector<16x32xf32>
    %cst_62 = arith.constant dense<0.000000e+00> : vector<16xf32>
    %161 = vector.multi_reduction <add>, %160, %cst_62 [1] : vector<16x32xf32> to vector<16xf32>
    %162 = vector.shape_cast %161 : vector<16xf32> to vector<16x1xf32>
    %cst_63 = arith.constant 3.200000e+01 : f32
    %163 = vector.broadcast %cst_63 : f32 to vector<16x1xf32>
    %164 = arith.divf %162, %163 : vector<16x1xf32>
    %165 = vector.broadcast %157 : vector<16x1xf32> to vector<16x32xf32>
    %166 = arith.subf %149, %165 : vector<16x32xf32>
    %cst_64 = arith.constant 9.99999974E-6 : f32
    %167 = vector.broadcast %cst_64 : f32 to vector<16x1xf32>
    %168 = arith.addf %164, %167 : vector<16x1xf32>
    %169 = math.rsqrt %168 : vector<16x1xf32>
    %170 = vector.broadcast %169 : vector<16x1xf32> to vector<16x32xf32>
    %171 = arith.mulf %166, %170 : vector<16x32xf32>
    %172 = vector.broadcast %151 : vector<1x32xf32> to vector<16x32xf32>
    %173 = arith.mulf %171, %172 : vector<16x32xf32>
    %174 = vector.broadcast %153 : vector<1x32xf32> to vector<16x32xf32>
    %175 = arith.addf %173, %174 : vector<16x32xf32>
    %c0_65 = arith.constant 0 : index
    %c0_66 = arith.constant 0 : index
    %c0_67 = arith.constant 0 : index
    %176 = vector.load %arg13[%c0_65, %c0_66, %c0_67] : memref<2x32x128xf32, #tpu.memory_space<vmem>>, vector<1x32x128xf32>
    %177 = vector.shape_cast %176 : vector<1x32x128xf32> to vector<32x128xf32>
    %cst_68 = arith.constant dense<0.000000e+00> : vector<16x128xf32>
    %178 = tpu.matmul %175, %177, %cst_68 {dimension_numbers = #tpu.dot_dimension_numbers<[1], [0], [0], [1], [0, 0, 1, 1], [], []>} : vector<16x32xf32>, vector<32x128xf32>, vector<16x128xf32> -> vector<16x128xf32>
    %c0_69 = arith.constant 0 : index
    %c0_70 = arith.constant 0 : index
    %c0_71 = arith.constant 0 : index
    %179 = vector.load %arg14[%c0_69, %c0_70, %c0_71] : memref<2x1x128xf32, #tpu.memory_space<vmem>>, vector<1x1x128xf32>
    %180 = vector.shape_cast %179 : vector<1x1x128xf32> to vector<1x128xf32>
    %181 = vector.broadcast %180 : vector<1x128xf32> to vector<16x128xf32>
    %182 = arith.addf %178, %181 : vector<16x128xf32>
    %cst_72 = arith.constant 1.702000e+00 : f32
    %183 = vector.broadcast %cst_72 : f32 to vector<16x128xf32>
    %184 = arith.mulf %183, %182 : vector<16x128xf32>
    %185 = arith.negf %184 : vector<16x128xf32>
    %186 = math.exp %185 : vector<16x128xf32>
    %cst_73 = arith.constant 1.000000e+00 : f32
    %187 = vector.broadcast %cst_73 : f32 to vector<16x128xf32>
    %188 = arith.addf %187, %186 : vector<16x128xf32>
    %189 = arith.divf %187, %188 : vector<16x128xf32>
    %190 = arith.mulf %182, %189 : vector<16x128xf32>
    %c0_74 = arith.constant 0 : index
    %c0_75 = arith.constant 0 : index
    %c0_76 = arith.constant 0 : index
    %191 = vector.load %arg15[%c0_74, %c0_75, %c0_76] : memref<2x128x32xf32, #tpu.memory_space<vmem>>, vector<1x128x32xf32>
    %192 = vector.shape_cast %191 : vector<1x128x32xf32> to vector<128x32xf32>
    %cst_77 = arith.constant dense<0.000000e+00> : vector<16x32xf32>
    %193 = tpu.matmul %190, %192, %cst_77 {dimension_numbers = #tpu.dot_dimension_numbers<[1], [0], [0], [1], [0, 0, 1, 1], [], []>} : vector<16x128xf32>, vector<128x32xf32>, vector<16x32xf32> -> vector<16x32xf32>
    %c0_78 = arith.constant 0 : index
    %c0_79 = arith.constant 0 : index
    %c0_80 = arith.constant 0 : index
    %194 = vector.load %arg16[%c0_78, %c0_79, %c0_80] : memref<2x1x32xf32, #tpu.memory_space<vmem>>, vector<1x1x32xf32>
    %195 = vector.shape_cast %194 : vector<1x1x32xf32> to vector<1x32xf32>
    %196 = vector.broadcast %195 : vector<1x32xf32> to vector<16x32xf32>
    %197 = arith.addf %193, %196 : vector<16x32xf32>
    %198 = arith.addf %149, %197 : vector<16x32xf32>
    %c1 = arith.constant 1 : index
    %c0_81 = arith.constant 0 : index
    %c0_82 = arith.constant 0 : index
    %199 = vector.load %arg5[%c1, %c0_81, %c0_82] : memref<2x1x32xf32, #tpu.memory_space<vmem>>, vector<1x1x32xf32>
    %200 = vector.shape_cast %199 : vector<1x1x32xf32> to vector<1x32xf32>
    %c1_83 = arith.constant 1 : index
    %c0_84 = arith.constant 0 : index
    %c0_85 = arith.constant 0 : index
    %201 = vector.load %arg6[%c1_83, %c0_84, %c0_85] : memref<2x1x32xf32, #tpu.memory_space<vmem>>, vector<1x1x32xf32>
    %202 = vector.shape_cast %201 : vector<1x1x32xf32> to vector<1x32xf32>
    %cst_86 = arith.constant dense<0.000000e+00> : vector<16xf32>
    %203 = vector.multi_reduction <add>, %198, %cst_86 [1] : vector<16x32xf32> to vector<16xf32>
    %204 = vector.shape_cast %203 : vector<16xf32> to vector<16x1xf32>
    %cst_87 = arith.constant 3.200000e+01 : f32
    %205 = vector.broadcast %cst_87 : f32 to vector<16x1xf32>
    %206 = arith.divf %204, %205 : vector<16x1xf32>
    %207 = vector.broadcast %206 : vector<16x1xf32> to vector<16x32xf32>
    %208 = arith.subf %198, %207 : vector<16x32xf32>
    %209 = arith.mulf %208, %208 : vector<16x32xf32>
    %cst_88 = arith.constant dense<0.000000e+00> : vector<16xf32>
    %210 = vector.multi_reduction <add>, %209, %cst_88 [1] : vector<16x32xf32> to vector<16xf32>
    %211 = vector.shape_cast %210 : vector<16xf32> to vector<16x1xf32>
    %cst_89 = arith.constant 3.200000e+01 : f32
    %212 = vector.broadcast %cst_89 : f32 to vector<16x1xf32>
    %213 = arith.divf %211, %212 : vector<16x1xf32>
    %214 = vector.broadcast %206 : vector<16x1xf32> to vector<16x32xf32>
    %215 = arith.subf %198, %214 : vector<16x32xf32>
    %cst_90 = arith.constant 9.99999974E-6 : f32
    %216 = vector.broadcast %cst_90 : f32 to vector<16x1xf32>
    %217 = arith.addf %213, %216 : vector<16x1xf32>
    %218 = math.rsqrt %217 : vector<16x1xf32>
    %219 = vector.broadcast %218 : vector<16x1xf32> to vector<16x32xf32>
    %220 = arith.mulf %215, %219 : vector<16x32xf32>
    %221 = vector.broadcast %200 : vector<1x32xf32> to vector<16x32xf32>
    %222 = arith.mulf %220, %221 : vector<16x32xf32>
    %223 = vector.broadcast %202 : vector<1x32xf32> to vector<16x32xf32>
    %224 = arith.addf %222, %223 : vector<16x32xf32>
    %c1_91 = arith.constant 1 : index
    %c0_92 = arith.constant 0 : index
    %c0_93 = arith.constant 0 : index
    %225 = vector.load %arg7[%c1_91, %c0_92, %c0_93] : memref<2x32x96xf32, #tpu.memory_space<vmem>>, vector<1x32x96xf32>
    %226 = vector.shape_cast %225 : vector<1x32x96xf32> to vector<32x96xf32>
    %cst_94 = arith.constant dense<0.000000e+00> : vector<16x96xf32>
    %227 = tpu.matmul %224, %226, %cst_94 {dimension_numbers = #tpu.dot_dimension_numbers<[1], [0], [0], [1], [0, 0, 1, 1], [], []>} : vector<16x32xf32>, vector<32x96xf32>, vector<16x96xf32> -> vector<16x96xf32>
    %c1_95 = arith.constant 1 : index
    %c0_96 = arith.constant 0 : index
    %c0_97 = arith.constant 0 : index
    %228 = vector.load %arg8[%c1_95, %c0_96, %c0_97] : memref<2x1x96xf32, #tpu.memory_space<vmem>>, vector<1x1x96xf32>
    %229 = vector.shape_cast %228 : vector<1x1x96xf32> to vector<1x96xf32>
    %230 = vector.broadcast %229 : vector<1x96xf32> to vector<16x96xf32>
    %231 = arith.addf %227, %230 : vector<16x96xf32>
    %232 = vector.extract_strided_slice %231 {offsets = [0, 0], sizes = [16, 32], strides = [1, 1]} : vector<16x96xf32> to vector<16x32xf32>
    %233 = vector.shape_cast %232 : vector<16x32xf32> to vector<2x8x32xf32>
    %234 = vector.extract_strided_slice %231 {offsets = [0, 32], sizes = [16, 32], strides = [1, 1]} : vector<16x96xf32> to vector<16x32xf32>
    %235 = vector.shape_cast %234 : vector<16x32xf32> to vector<2x8x32xf32>
    %236 = vector.extract_strided_slice %231 {offsets = [0, 64], sizes = [16, 32], strides = [1, 1]} : vector<16x96xf32> to vector<16x32xf32>
    %237 = vector.shape_cast %236 : vector<16x32xf32> to vector<2x8x32xf32>
    %c1_98 = arith.constant 1 : index
    %c0_99 = arith.constant 0 : index
    %c0_100 = arith.constant 0 : index
    %238 = vector.load %arg9[%c1_98, %c0_99, %c0_100] : memref<2x32x32xf32, #tpu.memory_space<vmem>>, vector<1x32x32xf32>
    %239 = vector.shape_cast %238 : vector<1x32x32xf32> to vector<32x32xf32>
    %cst_101 = arith.constant 0.000000e+00 : f32
    %240 = vector.broadcast %cst_101 : f32 to vector<16x32xf32>
    %241 = vector.extract_strided_slice %233 {offsets = [0, 0, 0], sizes = [2, 8, 8], strides = [1, 1, 1]} : vector<2x8x32xf32> to vector<2x8x8xf32>
    %242 = vector.extract_strided_slice %235 {offsets = [0, 0, 0], sizes = [2, 8, 8], strides = [1, 1, 1]} : vector<2x8x32xf32> to vector<2x8x8xf32>
    "tpu.trace_start"() <{level = 10 : i32, message = "bld,bmd->blm"}> : () -> ()
    %cst_102 = arith.constant dense<0.000000e+00> : vector<2x8x8xf32>
    %243 = tpu.matmul %241, %242, %cst_102 {dimension_numbers = #tpu.dot_dimension_numbers<[2], [2], [1], [1], [0, 0, 0, 1, 1, 1], [0], [0]>} : vector<2x8x8xf32>, vector<2x8x8xf32>, vector<2x8x8xf32> -> vector<2x8x8xf32>
    "tpu.trace_stop"() : () -> ()
    %cst_103 = arith.constant 0.353553385 : f32
    %244 = vector.broadcast %cst_103 : f32 to vector<2x8x8xf32>
    %245 = arith.mulf %243, %244 : vector<2x8x8xf32>
    %246 = vector.shape_cast %0 : vector<8x8xf32> to vector<1x8x8xf32>
    %247 = vector.broadcast %246 : vector<1x8x8xf32> to vector<2x8x8xf32>
    %248 = arith.addf %245, %247 : vector<2x8x8xf32>
    %cst_104 = arith.constant dense<0xFF800000> : vector<2x8xf32>
    %249 = vector.multi_reduction <maximumf>, %248, %cst_104 [2] : vector<2x8x8xf32> to vector<2x8xf32>
    %250 = vector.shape_cast %249 : vector<2x8xf32> to vector<2x8x1xf32>
    %251 = vector.broadcast %250 : vector<2x8x1xf32> to vector<2x8x8xf32>
    %252 = arith.subf %248, %251 : vector<2x8x8xf32>
    %253 = math.exp %252 : vector<2x8x8xf32>
    %cst_105 = arith.constant dense<0.000000e+00> : vector<2x8xf32>
    %254 = vector.multi_reduction <add>, %253, %cst_105 [2] : vector<2x8x8xf32> to vector<2x8xf32>
    %255 = vector.shape_cast %254 : vector<2x8xf32> to vector<2x8x1xf32>
    %256 = tpu.reciprocal %255 {approx = true} : vector<2x8x1xf32> -> vector<2x8x1xf32>
    %257 = vector.broadcast %256 : vector<2x8x1xf32> to vector<2x8x8xf32>
    %258 = arith.mulf %253, %257 : vector<2x8x8xf32>
    %259 = vector.extract_strided_slice %237 {offsets = [0, 0, 0], sizes = [2, 8, 8], strides = [1, 1, 1]} : vector<2x8x32xf32> to vector<2x8x8xf32>
    "tpu.trace_start"() <{level = 10 : i32, message = "blm,bmd->bld"}> : () -> ()
    %cst_106 = arith.constant dense<0.000000e+00> : vector<2x8x8xf32>
    %260 = tpu.matmul %258, %259, %cst_106 {dimension_numbers = #tpu.dot_dimension_numbers<[2], [1], [1], [2], [0, 0, 0, 1, 1, 2], [0], [0]>} : vector<2x8x8xf32>, vector<2x8x8xf32>, vector<2x8x8xf32> -> vector<2x8x8xf32>
    "tpu.trace_stop"() : () -> ()
    %261 = vector.shape_cast %260 : vector<2x8x8xf32> to vector<16x8xf32>
    %262 = vector.extract_strided_slice %239 {offsets = [0, 0], sizes = [8, 32], strides = [1, 1]} : vector<32x32xf32> to vector<8x32xf32>
    %cst_107 = arith.constant dense<0.000000e+00> : vector<16x32xf32>
    %263 = tpu.matmul %261, %262, %cst_107 {dimension_numbers = #tpu.dot_dimension_numbers<[1], [0], [0], [1], [0, 0, 1, 1], [], []>} : vector<16x8xf32>, vector<8x32xf32>, vector<16x32xf32> -> vector<16x32xf32>
    %264 = arith.addf %240, %263 : vector<16x32xf32>
    %265 = vector.extract_strided_slice %233 {offsets = [0, 0, 8], sizes = [2, 8, 8], strides = [1, 1, 1]} : vector<2x8x32xf32> to vector<2x8x8xf32>
    %266 = vector.extract_strided_slice %235 {offsets = [0, 0, 8], sizes = [2, 8, 8], strides = [1, 1, 1]} : vector<2x8x32xf32> to vector<2x8x8xf32>
    "tpu.trace_start"() <{level = 10 : i32, message = "bld,bmd->blm"}> : () -> ()
    %cst_108 = arith.constant dense<0.000000e+00> : vector<2x8x8xf32>
    %267 = tpu.matmul %265, %266, %cst_108 {dimension_numbers = #tpu.dot_dimension_numbers<[2], [2], [1], [1], [0, 0, 0, 1, 1, 1], [0], [0]>} : vector<2x8x8xf32>, vector<2x8x8xf32>, vector<2x8x8xf32> -> vector<2x8x8xf32>
    "tpu.trace_stop"() : () -> ()
    %cst_109 = arith.constant 0.353553385 : f32
    %268 = vector.broadcast %cst_109 : f32 to vector<2x8x8xf32>
    %269 = arith.mulf %267, %268 : vector<2x8x8xf32>
    %270 = vector.shape_cast %0 : vector<8x8xf32> to vector<1x8x8xf32>
    %271 = vector.broadcast %270 : vector<1x8x8xf32> to vector<2x8x8xf32>
    %272 = arith.addf %269, %271 : vector<2x8x8xf32>
    %cst_110 = arith.constant dense<0xFF800000> : vector<2x8xf32>
    %273 = vector.multi_reduction <maximumf>, %272, %cst_110 [2] : vector<2x8x8xf32> to vector<2x8xf32>
    %274 = vector.shape_cast %273 : vector<2x8xf32> to vector<2x8x1xf32>
    %275 = vector.broadcast %274 : vector<2x8x1xf32> to vector<2x8x8xf32>
    %276 = arith.subf %272, %275 : vector<2x8x8xf32>
    %277 = math.exp %276 : vector<2x8x8xf32>
    %cst_111 = arith.constant dense<0.000000e+00> : vector<2x8xf32>
    %278 = vector.multi_reduction <add>, %277, %cst_111 [2] : vector<2x8x8xf32> to vector<2x8xf32>
    %279 = vector.shape_cast %278 : vector<2x8xf32> to vector<2x8x1xf32>
    %280 = tpu.reciprocal %279 {approx = true} : vector<2x8x1xf32> -> vector<2x8x1xf32>
    %281 = vector.broadcast %280 : vector<2x8x1xf32> to vector<2x8x8xf32>
    %282 = arith.mulf %277, %281 : vector<2x8x8xf32>
    %283 = vector.extract_strided_slice %237 {offsets = [0, 0, 8], sizes = [2, 8, 8], strides = [1, 1, 1]} : vector<2x8x32xf32> to vector<2x8x8xf32>
    "tpu.trace_start"() <{level = 10 : i32, message = "blm,bmd->bld"}> : () -> ()
    %cst_112 = arith.constant dense<0.000000e+00> : vector<2x8x8xf32>
    %284 = tpu.matmul %282, %283, %cst_112 {dimension_numbers = #tpu.dot_dimension_numbers<[2], [1], [1], [2], [0, 0, 0, 1, 1, 2], [0], [0]>} : vector<2x8x8xf32>, vector<2x8x8xf32>, vector<2x8x8xf32> -> vector<2x8x8xf32>
    "tpu.trace_stop"() : () -> ()
    %285 = vector.shape_cast %284 : vector<2x8x8xf32> to vector<16x8xf32>
    %286 = vector.extract_strided_slice %239 {offsets = [8, 0], sizes = [8, 32], strides = [1, 1]} : vector<32x32xf32> to vector<8x32xf32>
    %cst_113 = arith.constant dense<0.000000e+00> : vector<16x32xf32>
    %287 = tpu.matmul %285, %286, %cst_113 {dimension_numbers = #tpu.dot_dimension_numbers<[1], [0], [0], [1], [0, 0, 1, 1], [], []>} : vector<16x8xf32>, vector<8x32xf32>, vector<16x32xf32> -> vector<16x32xf32>
    %288 = arith.addf %264, %287 : vector<16x32xf32>
    %289 = vector.extract_strided_slice %233 {offsets = [0, 0, 16], sizes = [2, 8, 8], strides = [1, 1, 1]} : vector<2x8x32xf32> to vector<2x8x8xf32>
    %290 = vector.extract_strided_slice %235 {offsets = [0, 0, 16], sizes = [2, 8, 8], strides = [1, 1, 1]} : vector<2x8x32xf32> to vector<2x8x8xf32>
    "tpu.trace_start"() <{level = 10 : i32, message = "bld,bmd->blm"}> : () -> ()
    %cst_114 = arith.constant dense<0.000000e+00> : vector<2x8x8xf32>
    %291 = tpu.matmul %289, %290, %cst_114 {dimension_numbers = #tpu.dot_dimension_numbers<[2], [2], [1], [1], [0, 0, 0, 1, 1, 1], [0], [0]>} : vector<2x8x8xf32>, vector<2x8x8xf32>, vector<2x8x8xf32> -> vector<2x8x8xf32>
    "tpu.trace_stop"() : () -> ()
    %cst_115 = arith.constant 0.353553385 : f32
    %292 = vector.broadcast %cst_115 : f32 to vector<2x8x8xf32>
    %293 = arith.mulf %291, %292 : vector<2x8x8xf32>
    %294 = vector.shape_cast %0 : vector<8x8xf32> to vector<1x8x8xf32>
    %295 = vector.broadcast %294 : vector<1x8x8xf32> to vector<2x8x8xf32>
    %296 = arith.addf %293, %295 : vector<2x8x8xf32>
    %cst_116 = arith.constant dense<0xFF800000> : vector<2x8xf32>
    %297 = vector.multi_reduction <maximumf>, %296, %cst_116 [2] : vector<2x8x8xf32> to vector<2x8xf32>
    %298 = vector.shape_cast %297 : vector<2x8xf32> to vector<2x8x1xf32>
    %299 = vector.broadcast %298 : vector<2x8x1xf32> to vector<2x8x8xf32>
    %300 = arith.subf %296, %299 : vector<2x8x8xf32>
    %301 = math.exp %300 : vector<2x8x8xf32>
    %cst_117 = arith.constant dense<0.000000e+00> : vector<2x8xf32>
    %302 = vector.multi_reduction <add>, %301, %cst_117 [2] : vector<2x8x8xf32> to vector<2x8xf32>
    %303 = vector.shape_cast %302 : vector<2x8xf32> to vector<2x8x1xf32>
    %304 = tpu.reciprocal %303 {approx = true} : vector<2x8x1xf32> -> vector<2x8x1xf32>
    %305 = vector.broadcast %304 : vector<2x8x1xf32> to vector<2x8x8xf32>
    %306 = arith.mulf %301, %305 : vector<2x8x8xf32>
    %307 = vector.extract_strided_slice %237 {offsets = [0, 0, 16], sizes = [2, 8, 8], strides = [1, 1, 1]} : vector<2x8x32xf32> to vector<2x8x8xf32>
    "tpu.trace_start"() <{level = 10 : i32, message = "blm,bmd->bld"}> : () -> ()
    %cst_118 = arith.constant dense<0.000000e+00> : vector<2x8x8xf32>
    %308 = tpu.matmul %306, %307, %cst_118 {dimension_numbers = #tpu.dot_dimension_numbers<[2], [1], [1], [2], [0, 0, 0, 1, 1, 2], [0], [0]>} : vector<2x8x8xf32>, vector<2x8x8xf32>, vector<2x8x8xf32> -> vector<2x8x8xf32>
    "tpu.trace_stop"() : () -> ()
    %309 = vector.shape_cast %308 : vector<2x8x8xf32> to vector<16x8xf32>
    %310 = vector.extract_strided_slice %239 {offsets = [16, 0], sizes = [8, 32], strides = [1, 1]} : vector<32x32xf32> to vector<8x32xf32>
    %cst_119 = arith.constant dense<0.000000e+00> : vector<16x32xf32>
    %311 = tpu.matmul %309, %310, %cst_119 {dimension_numbers = #tpu.dot_dimension_numbers<[1], [0], [0], [1], [0, 0, 1, 1], [], []>} : vector<16x8xf32>, vector<8x32xf32>, vector<16x32xf32> -> vector<16x32xf32>
    %312 = arith.addf %288, %311 : vector<16x32xf32>
    %313 = vector.extract_strided_slice %233 {offsets = [0, 0, 24], sizes = [2, 8, 8], strides = [1, 1, 1]} : vector<2x8x32xf32> to vector<2x8x8xf32>
    %314 = vector.extract_strided_slice %235 {offsets = [0, 0, 24], sizes = [2, 8, 8], strides = [1, 1, 1]} : vector<2x8x32xf32> to vector<2x8x8xf32>
    "tpu.trace_start"() <{level = 10 : i32, message = "bld,bmd->blm"}> : () -> ()
    %cst_120 = arith.constant dense<0.000000e+00> : vector<2x8x8xf32>
    %315 = tpu.matmul %313, %314, %cst_120 {dimension_numbers = #tpu.dot_dimension_numbers<[2], [2], [1], [1], [0, 0, 0, 1, 1, 1], [0], [0]>} : vector<2x8x8xf32>, vector<2x8x8xf32>, vector<2x8x8xf32> -> vector<2x8x8xf32>
    "tpu.trace_stop"() : () -> ()
    %cst_121 = arith.constant 0.353553385 : f32
    %316 = vector.broadcast %cst_121 : f32 to vector<2x8x8xf32>
    %317 = arith.mulf %315, %316 : vector<2x8x8xf32>
    %318 = vector.shape_cast %0 : vector<8x8xf32> to vector<1x8x8xf32>
    %319 = vector.broadcast %318 : vector<1x8x8xf32> to vector<2x8x8xf32>
    %320 = arith.addf %317, %319 : vector<2x8x8xf32>
    %cst_122 = arith.constant dense<0xFF800000> : vector<2x8xf32>
    %321 = vector.multi_reduction <maximumf>, %320, %cst_122 [2] : vector<2x8x8xf32> to vector<2x8xf32>
    %322 = vector.shape_cast %321 : vector<2x8xf32> to vector<2x8x1xf32>
    %323 = vector.broadcast %322 : vector<2x8x1xf32> to vector<2x8x8xf32>
    %324 = arith.subf %320, %323 : vector<2x8x8xf32>
    %325 = math.exp %324 : vector<2x8x8xf32>
    %cst_123 = arith.constant dense<0.000000e+00> : vector<2x8xf32>
    %326 = vector.multi_reduction <add>, %325, %cst_123 [2] : vector<2x8x8xf32> to vector<2x8xf32>
    %327 = vector.shape_cast %326 : vector<2x8xf32> to vector<2x8x1xf32>
    %328 = tpu.reciprocal %327 {approx = true} : vector<2x8x1xf32> -> vector<2x8x1xf32>
    %329 = vector.broadcast %328 : vector<2x8x1xf32> to vector<2x8x8xf32>
    %330 = arith.mulf %325, %329 : vector<2x8x8xf32>
    %331 = vector.extract_strided_slice %237 {offsets = [0, 0, 24], sizes = [2, 8, 8], strides = [1, 1, 1]} : vector<2x8x32xf32> to vector<2x8x8xf32>
    "tpu.trace_start"() <{level = 10 : i32, message = "blm,bmd->bld"}> : () -> ()
    %cst_124 = arith.constant dense<0.000000e+00> : vector<2x8x8xf32>
    %332 = tpu.matmul %330, %331, %cst_124 {dimension_numbers = #tpu.dot_dimension_numbers<[2], [1], [1], [2], [0, 0, 0, 1, 1, 2], [0], [0]>} : vector<2x8x8xf32>, vector<2x8x8xf32>, vector<2x8x8xf32> -> vector<2x8x8xf32>
    "tpu.trace_stop"() : () -> ()
    %333 = vector.shape_cast %332 : vector<2x8x8xf32> to vector<16x8xf32>
    %334 = vector.extract_strided_slice %239 {offsets = [24, 0], sizes = [8, 32], strides = [1, 1]} : vector<32x32xf32> to vector<8x32xf32>
    %cst_125 = arith.constant dense<0.000000e+00> : vector<16x32xf32>
    %335 = tpu.matmul %333, %334, %cst_125 {dimension_numbers = #tpu.dot_dimension_numbers<[1], [0], [0], [1], [0, 0, 1, 1], [], []>} : vector<16x8xf32>, vector<8x32xf32>, vector<16x32xf32> -> vector<16x32xf32>
    %336 = arith.addf %312, %335 : vector<16x32xf32>
    %337 = arith.addf %198, %336 : vector<16x32xf32>
    %c1_126 = arith.constant 1 : index
    %c0_127 = arith.constant 0 : index
    %c0_128 = arith.constant 0 : index
    %338 = vector.load %arg10[%c1_126, %c0_127, %c0_128] : memref<2x1x32xf32, #tpu.memory_space<vmem>>, vector<1x1x32xf32>
    %339 = vector.shape_cast %338 : vector<1x1x32xf32> to vector<1x32xf32>
    %340 = vector.broadcast %339 : vector<1x32xf32> to vector<16x32xf32>
    %341 = arith.addf %337, %340 : vector<16x32xf32>
    %c1_129 = arith.constant 1 : index
    %c0_130 = arith.constant 0 : index
    %c0_131 = arith.constant 0 : index
    %342 = vector.load %arg11[%c1_129, %c0_130, %c0_131] : memref<2x1x32xf32, #tpu.memory_space<vmem>>, vector<1x1x32xf32>
    %343 = vector.shape_cast %342 : vector<1x1x32xf32> to vector<1x32xf32>
    %c1_132 = arith.constant 1 : index
    %c0_133 = arith.constant 0 : index
    %c0_134 = arith.constant 0 : index
    %344 = vector.load %arg12[%c1_132, %c0_133, %c0_134] : memref<2x1x32xf32, #tpu.memory_space<vmem>>, vector<1x1x32xf32>
    %345 = vector.shape_cast %344 : vector<1x1x32xf32> to vector<1x32xf32>
    %cst_135 = arith.constant dense<0.000000e+00> : vector<16xf32>
    %346 = vector.multi_reduction <add>, %341, %cst_135 [1] : vector<16x32xf32> to vector<16xf32>
    %347 = vector.shape_cast %346 : vector<16xf32> to vector<16x1xf32>
    %cst_136 = arith.constant 3.200000e+01 : f32
    %348 = vector.broadcast %cst_136 : f32 to vector<16x1xf32>
    %349 = arith.divf %347, %348 : vector<16x1xf32>
    %350 = vector.broadcast %349 : vector<16x1xf32> to vector<16x32xf32>
    %351 = arith.subf %341, %350 : vector<16x32xf32>
    %352 = arith.mulf %351, %351 : vector<16x32xf32>
    %cst_137 = arith.constant dense<0.000000e+00> : vector<16xf32>
    %353 = vector.multi_reduction <add>, %352, %cst_137 [1] : vector<16x32xf32> to vector<16xf32>
    %354 = vector.shape_cast %353 : vector<16xf32> to vector<16x1xf32>
    %cst_138 = arith.constant 3.200000e+01 : f32
    %355 = vector.broadcast %cst_138 : f32 to vector<16x1xf32>
    %356 = arith.divf %354, %355 : vector<16x1xf32>
    %357 = vector.broadcast %349 : vector<16x1xf32> to vector<16x32xf32>
    %358 = arith.subf %341, %357 : vector<16x32xf32>
    %cst_139 = arith.constant 9.99999974E-6 : f32
    %359 = vector.broadcast %cst_139 : f32 to vector<16x1xf32>
    %360 = arith.addf %356, %359 : vector<16x1xf32>
    %361 = math.rsqrt %360 : vector<16x1xf32>
    %362 = vector.broadcast %361 : vector<16x1xf32> to vector<16x32xf32>
    %363 = arith.mulf %358, %362 : vector<16x32xf32>
    %364 = vector.broadcast %343 : vector<1x32xf32> to vector<16x32xf32>
    %365 = arith.mulf %363, %364 : vector<16x32xf32>
    %366 = vector.broadcast %345 : vector<1x32xf32> to vector<16x32xf32>
    %367 = arith.addf %365, %366 : vector<16x32xf32>
    %c1_140 = arith.constant 1 : index
    %c0_141 = arith.constant 0 : index
    %c0_142 = arith.constant 0 : index
    %368 = vector.load %arg13[%c1_140, %c0_141, %c0_142] : memref<2x32x128xf32, #tpu.memory_space<vmem>>, vector<1x32x128xf32>
    %369 = vector.shape_cast %368 : vector<1x32x128xf32> to vector<32x128xf32>
    %cst_143 = arith.constant dense<0.000000e+00> : vector<16x128xf32>
    %370 = tpu.matmul %367, %369, %cst_143 {dimension_numbers = #tpu.dot_dimension_numbers<[1], [0], [0], [1], [0, 0, 1, 1], [], []>} : vector<16x32xf32>, vector<32x128xf32>, vector<16x128xf32> -> vector<16x128xf32>
    %c1_144 = arith.constant 1 : index
    %c0_145 = arith.constant 0 : index
    %c0_146 = arith.constant 0 : index
    %371 = vector.load %arg14[%c1_144, %c0_145, %c0_146] : memref<2x1x128xf32, #tpu.memory_space<vmem>>, vector<1x1x128xf32>
    %372 = vector.shape_cast %371 : vector<1x1x128xf32> to vector<1x128xf32>
    %373 = vector.broadcast %372 : vector<1x128xf32> to vector<16x128xf32>
    %374 = arith.addf %370, %373 : vector<16x128xf32>
    %cst_147 = arith.constant 1.702000e+00 : f32
    %375 = vector.broadcast %cst_147 : f32 to vector<16x128xf32>
    %376 = arith.mulf %375, %374 : vector<16x128xf32>
    %377 = arith.negf %376 : vector<16x128xf32>
    %378 = math.exp %377 : vector<16x128xf32>
    %cst_148 = arith.constant 1.000000e+00 : f32
    %379 = vector.broadcast %cst_148 : f32 to vector<16x128xf32>
    %380 = arith.addf %379, %378 : vector<16x128xf32>
    %381 = arith.divf %379, %380 : vector<16x128xf32>
    %382 = arith.mulf %374, %381 : vector<16x128xf32>
    %c1_149 = arith.constant 1 : index
    %c0_150 = arith.constant 0 : index
    %c0_151 = arith.constant 0 : index
    %383 = vector.load %arg15[%c1_149, %c0_150, %c0_151] : memref<2x128x32xf32, #tpu.memory_space<vmem>>, vector<1x128x32xf32>
    %384 = vector.shape_cast %383 : vector<1x128x32xf32> to vector<128x32xf32>
    %cst_152 = arith.constant dense<0.000000e+00> : vector<16x32xf32>
    %385 = tpu.matmul %382, %384, %cst_152 {dimension_numbers = #tpu.dot_dimension_numbers<[1], [0], [0], [1], [0, 0, 1, 1], [], []>} : vector<16x128xf32>, vector<128x32xf32>, vector<16x32xf32> -> vector<16x32xf32>
    %c1_153 = arith.constant 1 : index
    %c0_154 = arith.constant 0 : index
    %c0_155 = arith.constant 0 : index
    %386 = vector.load %arg16[%c1_153, %c0_154, %c0_155] : memref<2x1x32xf32, #tpu.memory_space<vmem>>, vector<1x1x32xf32>
    %387 = vector.shape_cast %386 : vector<1x1x32xf32> to vector<1x32xf32>
    %388 = vector.broadcast %387 : vector<1x32xf32> to vector<16x32xf32>
    %389 = arith.addf %385, %388 : vector<16x32xf32>
    %390 = arith.addf %341, %389 : vector<16x32xf32>
    %391 = tpu.iota {dimensions = array<i32: 1>} : vector<2x16xi32>
    %392 = tpu.iota {dimensions = array<i32: 0>} : vector<2x16xi32>
    %c8_i32 = arith.constant 8 : i32
    %393 = vector.broadcast %c8_i32 : i32 to vector<2x16xi32>
    %394 = arith.muli %392, %393 : vector<2x16xi32>
    %c0_i32 = arith.constant 0 : i32
    %395 = vector.broadcast %c0_i32 : i32 to vector<2x16xi32>
    %396 = arith.cmpi eq, %392, %395 : vector<2x16xi32>
    %c0_156 = arith.constant 0 : index
    %397 = memref.load %arg1[%c0_156] : memref<2xi32, #tpu.memory_space<smem>>
    %c0_i32_157 = arith.constant 0 : i32
    %398 = vector.broadcast %397 : i32 to vector<2x16xi32>
    %399 = vector.broadcast %c0_i32_157 : i32 to vector<2x16xi32>
    %400 = arith.select %396, %398, %399 : vector<2x16xi1>, vector<2x16xi32>
    %401 = arith.addi %394, %400 : vector<2x16xi32>
    %c1_i32 = arith.constant 1 : i32
    %402 = vector.broadcast %c1_i32 : i32 to vector<2x16xi32>
    %403 = arith.cmpi eq, %392, %402 : vector<2x16xi32>
    %c1_158 = arith.constant 1 : index
    %404 = memref.load %arg1[%c1_158] : memref<2xi32, #tpu.memory_space<smem>>
    %c0_i32_159 = arith.constant 0 : i32
    %405 = vector.broadcast %404 : i32 to vector<2x16xi32>
    %406 = vector.broadcast %c0_i32_159 : i32 to vector<2x16xi32>
    %407 = arith.select %403, %405, %406 : vector<2x16xi1>, vector<2x16xi32>
    %408 = arith.addi %401, %407 : vector<2x16xi32>
    %409 = arith.cmpi eq, %391, %408 : vector<2x16xi32>
    %410 = arith.extui %409 : vector<2x16xi1> to vector<2x16xi32>
    %411 = arith.sitofp %410 : vector<2x16xi32> to vector<2x16xf32>
    %cst_160 = arith.constant dense<0.000000e+00> : vector<2x32xf32>
    %412 = tpu.matmul %411, %390, %cst_160 {dimension_numbers = #tpu.dot_dimension_numbers<[1], [0], [0], [1], [0, 0, 1, 1], [], []>} : vector<2x16xf32>, vector<16x32xf32>, vector<2x32xf32> -> vector<2x32xf32>
    %c0_161 = arith.constant 0 : index
    %c0_162 = arith.constant 0 : index
    %413 = vector.load %arg17[%c0_161, %c0_162] : memref<1x32xf32, #tpu.memory_space<vmem>>, vector<1x32xf32>
    %c0_163 = arith.constant 0 : index
    %c0_164 = arith.constant 0 : index
    %414 = vector.load %arg18[%c0_163, %c0_164] : memref<1x32xf32, #tpu.memory_space<vmem>>, vector<1x32xf32>
    %cst_165 = arith.constant dense<0.000000e+00> : vector<2xf32>
    %415 = vector.multi_reduction <add>, %412, %cst_165 [1] : vector<2x32xf32> to vector<2xf32>
    %416 = vector.shape_cast %415 : vector<2xf32> to vector<2x1xf32>
    %cst_166 = arith.constant 3.200000e+01 : f32
    %417 = vector.broadcast %cst_166 : f32 to vector<2x1xf32>
    %418 = arith.divf %416, %417 : vector<2x1xf32>
    %419 = vector.broadcast %418 : vector<2x1xf32> to vector<2x32xf32>
    %420 = arith.subf %412, %419 : vector<2x32xf32>
    %421 = arith.mulf %420, %420 : vector<2x32xf32>
    %cst_167 = arith.constant dense<0.000000e+00> : vector<2xf32>
    %422 = vector.multi_reduction <add>, %421, %cst_167 [1] : vector<2x32xf32> to vector<2xf32>
    %423 = vector.shape_cast %422 : vector<2xf32> to vector<2x1xf32>
    %cst_168 = arith.constant 3.200000e+01 : f32
    %424 = vector.broadcast %cst_168 : f32 to vector<2x1xf32>
    %425 = arith.divf %423, %424 : vector<2x1xf32>
    %426 = vector.broadcast %418 : vector<2x1xf32> to vector<2x32xf32>
    %427 = arith.subf %412, %426 : vector<2x32xf32>
    %cst_169 = arith.constant 9.99999974E-6 : f32
    %428 = vector.broadcast %cst_169 : f32 to vector<2x1xf32>
    %429 = arith.addf %425, %428 : vector<2x1xf32>
    %430 = math.rsqrt %429 : vector<2x1xf32>
    %431 = vector.broadcast %430 : vector<2x1xf32> to vector<2x32xf32>
    %432 = arith.mulf %427, %431 : vector<2x32xf32>
    %433 = vector.broadcast %413 : vector<1x32xf32> to vector<2x32xf32>
    %434 = arith.mulf %432, %433 : vector<2x32xf32>
    %435 = vector.broadcast %414 : vector<1x32xf32> to vector<2x32xf32>
    %436 = arith.addf %434, %435 : vector<2x32xf32>
    %c0_170 = arith.constant 0 : index
    %c0_171 = arith.constant 0 : index
    %437 = vector.load %arg19[%c0_170, %c0_171] : memref<32x16xf32, #tpu.memory_space<vmem>>, vector<32x16xf32>
    %cst_172 = arith.constant dense<0.000000e+00> : vector<2x16xf32>
    %438 = tpu.matmul %436, %437, %cst_172 {dimension_numbers = #tpu.dot_dimension_numbers<[1], [0], [0], [1], [0, 0, 1, 1], [], []>} : vector<2x32xf32>, vector<32x16xf32>, vector<2x16xf32> -> vector<2x16xf32>
    %c0_173 = arith.constant 0 : index
    %c0_174 = arith.constant 0 : index
    %439 = vector.load %arg20[%c0_173, %c0_174] : memref<2x16xf32, #tpu.memory_space<vmem>>, vector<2x16xf32>
    tpu.vector_store %arg20[%c0_173, %c0_174], %438 {strides = array<i32>} : memref<2x16xf32, #tpu.memory_space<vmem>>, vector<2x16xf32>,
    return
  }
  func.func @transform_0(%arg0: i32, %arg1: memref<2xi32, #tpu.memory_space<smem>>) -> (i32, i32, i32) {
    %c0_i32 = arith.constant 0 : i32
    %c0_i32_0 = arith.constant 0 : i32
    %c0_i32_1 = arith.constant 0 : i32
    %c0_i32_2 = arith.constant 0 : i32
    return %c0_i32, %c0_i32_0, %c0_i32_1 : i32, i32, i32
  }
  func.func @transform_1(%arg0: i32, %arg1: memref<2xi32, #tpu.memory_space<smem>>) -> (i32, i32) {
    %c0_i32 = arith.constant 0 : i32
    %c0_i32_0 = arith.constant 0 : i32
    %c0_i32_1 = arith.constant 0 : i32
    return %c0_i32, %c0_i32_0 : i32, i32
  }
  func.func @transform_2(%arg0: i32, %arg1: memref<2xi32, #tpu.memory_space<smem>>) -> (i32, i32) {
    %c0_i32 = arith.constant 0 : i32
    %c0_i32_0 = arith.constant 0 : i32
    %c0_i32_1 = arith.constant 0 : i32
    return %c0_i32, %c0_i32_0 : i32, i32
  }
  func.func @transform_3(%arg0: i32, %arg1: memref<2xi32, #tpu.memory_space<smem>>) -> (i32, i32, i32) {
    %c0_i32 = arith.constant 0 : i32
    %c0_i32_0 = arith.constant 0 : i32
    %c0_i32_1 = arith.constant 0 : i32
    %c0_i32_2 = arith.constant 0 : i32
    return %c0_i32, %c0_i32_0, %c0_i32_1 : i32, i32, i32
  }
  func.func @transform_4(%arg0: i32, %arg1: memref<2xi32, #tpu.memory_space<smem>>) -> (i32, i32, i32) {
    %c0_i32 = arith.constant 0 : i32
    %c0_i32_0 = arith.constant 0 : i32
    %c0_i32_1 = arith.constant 0 : i32
    %c0_i32_2 = arith.constant 0 : i32
    return %c0_i32, %c0_i32_0, %c0_i32_1 : i32, i32, i32
  }
  func.func @transform_5(%arg0: i32, %arg1: memref<2xi32, #tpu.memory_space<smem>>) -> (i32, i32, i32) {
    %c0_i32 = arith.constant 0 : i32
    %c0_i32_0 = arith.constant 0 : i32
    %c0_i32_1 = arith.constant 0 : i32
    %c0_i32_2 = arith.constant 0 : i32
    return %c0_i32, %c0_i32_0, %c0_i32_1 : i32, i32, i32
  }
  func.func @transform_6(%arg0: i32, %arg1: memref<2xi32, #tpu.memory_space<smem>>) -> (i32, i32, i32) {
    %c0_i32 = arith.constant 0 : i32
    %c0_i32_0 = arith.constant 0 : i32
    %c0_i32_1 = arith.constant 0 : i32
    %c0_i32_2 = arith.constant 0 : i32
    return %c0_i32, %c0_i32_0, %c0_i32_1 : i32, i32, i32
  }
  func.func @transform_7(%arg0: i32, %arg1: memref<2xi32, #tpu.memory_space<smem>>) -> (i32, i32, i32) {
    %c0_i32 = arith.constant 0 : i32
    %c0_i32_0 = arith.constant 0 : i32
    %c0_i32_1 = arith.constant 0 : i32
    %c0_i32_2 = arith.constant 0 : i32
    return %c0_i32, %c0_i32_0, %c0_i32_1 : i32, i32, i32
  }
  func.func @transform_8(%arg0: i32, %arg1: memref<2xi32, #tpu.memory_space<smem>>) -> (i32, i32, i32) {
    %c0_i32 = arith.constant 0 : i32
    %c0_i32_0 = arith.constant 0 : i32
    %c0_i32_1 = arith.constant 0 : i32
    %c0_i32_2 = arith.constant 0 : i32
    return %c0_i32, %c0_i32_0, %c0_i32_1 : i32, i32, i32
  }
  func.func @transform_9(%arg0: i32, %arg1: memref<2xi32, #tpu.memory_space<smem>>) -> (i32, i32, i32) {
    %c0_i32 = arith.constant 0 : i32
    %c0_i32_0 = arith.constant 0 : i32
    %c0_i32_1 = arith.constant 0 : i32
    %c0_i32_2 = arith.constant 0 : i32
    return %c0_i32, %c0_i32_0, %c0_i32_1 : i32, i32, i32
  }
  func.func @transform_10(%arg0: i32, %arg1: memref<2xi32, #tpu.memory_space<smem>>) -> (i32, i32, i32) {
    %c0_i32 = arith.constant 0 : i32
    %c0_i32_0 = arith.constant 0 : i32
    %c0_i32_1 = arith.constant 0 : i32
    %c0_i32_2 = arith.constant 0 : i32
    return %c0_i32, %c0_i32_0, %c0_i32_1 : i32, i32, i32
  }
  func.func @transform_11(%arg0: i32, %arg1: memref<2xi32, #tpu.memory_space<smem>>) -> (i32, i32, i32) {
    %c0_i32 = arith.constant 0 : i32
    %c0_i32_0 = arith.constant 0 : i32
    %c0_i32_1 = arith.constant 0 : i32
    %c0_i32_2 = arith.constant 0 : i32
    return %c0_i32, %c0_i32_0, %c0_i32_1 : i32, i32, i32
  }
  func.func @transform_12(%arg0: i32, %arg1: memref<2xi32, #tpu.memory_space<smem>>) -> (i32, i32, i32) {
    %c0_i32 = arith.constant 0 : i32
    %c0_i32_0 = arith.constant 0 : i32
    %c0_i32_1 = arith.constant 0 : i32
    %c0_i32_2 = arith.constant 0 : i32
    return %c0_i32, %c0_i32_0, %c0_i32_1 : i32, i32, i32
  }
  func.func @transform_13(%arg0: i32, %arg1: memref<2xi32, #tpu.memory_space<smem>>) -> (i32, i32, i32) {
    %c0_i32 = arith.constant 0 : i32
    %c0_i32_0 = arith.constant 0 : i32
    %c0_i32_1 = arith.constant 0 : i32
    %c0_i32_2 = arith.constant 0 : i32
    return %c0_i32, %c0_i32_0, %c0_i32_1 : i32, i32, i32
  }
  func.func @transform_14(%arg0: i32, %arg1: memref<2xi32, #tpu.memory_space<smem>>) -> (i32, i32, i32) {
    %c0_i32 = arith.constant 0 : i32
    %c0_i32_0 = arith.constant 0 : i32
    %c0_i32_1 = arith.constant 0 : i32
    %c0_i32_2 = arith.constant 0 : i32
    return %c0_i32, %c0_i32_0, %c0_i32_1 : i32, i32, i32
  }
  func.func @transform_15(%arg0: i32, %arg1: memref<2xi32, #tpu.memory_space<smem>>) -> (i32, i32) {
    %c0_i32 = arith.constant 0 : i32
    %c0_i32_0 = arith.constant 0 : i32
    %c0_i32_1 = arith.constant 0 : i32
    return %c0_i32, %c0_i32_0 : i32, i32
  }
  func.func @transform_16(%arg0: i32, %arg1: memref<2xi32, #tpu.memory_space<smem>>) -> (i32, i32) {
    %c0_i32 = arith.constant 0 : i32
    %c0_i32_0 = arith.constant 0 : i32
    %c0_i32_1 = arith.constant 0 : i32
    return %c0_i32, %c0_i32_0 : i32, i32
  }
  func.func @transform_17(%arg0: i32, %arg1: memref<2xi32, #tpu.memory_space<smem>>) -> (i32, i32) {
    %c0_i32 = arith.constant 0 : i32
    %c0_i32_0 = arith.constant 0 : i32
    %c0_i32_1 = arith.constant 0 : i32
    return %c0_i32, %c0_i32_0 : i32, i32
  }
  func.func @transform_18(%arg0: i32, %arg1: memref<2xi32, #tpu.memory_space<smem>>) -> (i32, i32) {
    %c0_i32 = arith.constant 0 : i32
    %c0_i32_0 = arith.constant 0 : i32
    %c0_i32_1 = arith.constant 0 : i32
    return %c0_i32, %c0_i32_0 : i32, i32
  }
}

</mosaic_0001>

<bundles_post_ra>
// kernel: tpu_custom_call.1
= control target key start
LH: loop header
LB: loop body
LE: loop exit
PB: predicated region body
PF: predicated region fallthrough
CT: control target
= control target key end

     0   :  { %s5987_s0 = inlined_call_operand.vmem [shape: s32[2], index: 0, kind: input, shape index: {}]   ;;  %s5988_s1 = inlined_call_operand.vmem [shape: f32[2,8,32], index: 1, kind: input, shape index: {}]   ;;  %s5989_s2 = inlined_call_operand.vmem [shape: f32[8,32], index: 2, kind: input, shape index: {}]   ;;  %s5990_s3 = inlined_call_operand.vmem [shape: f32[8,8], index: 3, kind: input, shape index: {}]   ;;  %s5991_s4 = inlined_call_operand.vmem [shape: f32[2,1,32], index: 4, kind: input, shape index: {}]   ;;  %s5992_s5 = inlined_call_operand.vmem [shape: f32[2,1,32], index: 5, kind: input, shape index: {}]   ;;  %s5993_s6 = inlined_call_operand.vmem [shape: f32[2,32,96], index: 6, kind: input, shape index: {}]   ;;  %s5994_s7 = inlined_call_operand.vmem [shape: f32[2,1,96], index: 7, kind: input, shape index: {}]   ;;  %s5995_s8 = inlined_call_operand.vmem [shape: f32[2,32,32], index: 8, kind: input, shape index: {}]   ;;  %s5996_s9 = inlined_call_operand.vmem [shape: f32[2,1,32], index: 9, kind: input, shape index: {}]   ;;  %s5997_s10 = inlined_call_operand.vmem [shape: f32[2,1,32], index: 10, kind: input, shape index: {}]   ;;  %s5998_s11 = inlined_call_operand.vmem [shape: f32[2,1,32], index: 11, kind: input, shape index: {}]   ;;  %s5999_s12 = inlined_call_operand.vmem [shape: f32[2,32,128], index: 12, kind: input, shape index: {}]   ;;  %s6000_s13 = inlined_call_operand.vmem [shape: f32[2,1,128], index: 13, kind: input, shape index: {}]   ;;  %s6001_s14 = inlined_call_operand.vmem [shape: f32[2,128,32], index: 14, kind: input, shape index: {}]   ;;  %s6002_s15 = inlined_call_operand.vmem [shape: f32[2,1,32], index: 15, kind: input, shape index: {}]   ;;  %s6003_s16 = inlined_call_operand.vmem [shape: f32[1,32], index: 16, kind: input, shape index: {}]   ;;  %s6004_s17 = inlined_call_operand.vmem [shape: f32[1,32], index: 17, kind: input, shape index: {}]   ;;  %s6005_s18 = inlined_call_operand.vmem [shape: f32[32,16], index: 18, kind: input, shape index: {}]   ;;  %s6006_s19 = inlined_call_operand.hbm [shape: f32[2,16], index: 19, kind: output, shape index: {}]  }
   0x1   :  { %6020 = sst [smem:[#allocation8_spill]] %s5987_s0 }
   0x2   :  { %6021 = sst [smem:[#allocation9_spill]] %s5988_s1 }
   0x3   :  { %6022 = sst [smem:[#allocation10_spill]] %s5989_s2 }
   0x4   :  { %6023 = sst [smem:[#allocation11_spill]] %s5990_s3 }
   0x5   :  { %6024 = sst [smem:[#allocation12_spill]] %s6000_s13 }
   0x6   :  { %s6025_s20 = sld [smem:[#allocation8_spill]] }
   0xc   :  { %s24_s13 = sshll.u32 %s6025_s20, 4  ;;  %s25_s13 = int_to_ptr.vmem [resolvable:$true] %s24_s13 }
   0xd   :  { %s5169_s21 = scalar_lea.vmem %s25_s13, 16  ;;  %p5174_p1 = scmp.lt.s32.totalorder %s25_s13, %s25_s13 }
   0xe   :  { %p5170_p0 = scmp.ne.s32.totalorder %s25_s13, %s5169_s21  ;;  %p5175_p2 = scmp.lt.s32.totalorder %s5169_s21, %s5169_s21 }
  0x10   :  { %p5176_p3 = por %p5175_p2, %p5174_p1 }
  0x12   :  { %p5177_p4 = pnand %p5176_p3, %p5170_p0 }
  0x14   :  { %5180 = shalt.err (!%p5177_p4)  }
  0x15   :  { %s5205_s1 = smov [#allocation3]  }
  0x16   :  { %27 = dma.vmem_to_smem %s25_s13, 16, %s5205_s1, [#allocation2] }
  0x17   :  { %5201 = dma.done.wait [#allocation2], 16 }
  0x18   :  { %5202 = vsyncadd [#allocation2], 4294967280 }
  0x19   :  { %29 = sfence }
  0x1a   :  { %s6026_s23 = sld [smem:[#allocation9_spill]]  ;;  %vm75_vm0 = vcmask 261120  }
  0x1b   :  { %s6027_s3 = sld [smem:[#allocation10_spill]] }
  0x20   :  { %v68_v0 = vld [vmem:[%s6026_s23] sm:$0xff]  ;;  %v69_v2 = vld [vmem:[%s6026_s23 + $0x8] sm:$0xff] }
  0x21   :  { %v70_v1 = vld [vmem:[%s6027_s3] sm:$0xff] }
  0x22   :  { %v5332_v3 = vadd.f32 %v70_v1, %v68_v0  ;;  %v5334_v4 = vadd.f32 %v70_v1, %v69_v2 }
  0x23   :  { %30 = vsyncpa [#allocation5], 0  ;;  %v122_v17 = vld [vmem:[%s5993_s6 + $0x18] sm:$0xff]  ;;  %v121_v18 = vld [vmem:[%s5993_s6 + $0x10] sm:$0xff]  ;;  %v5206_v37 = vmov 0.0   ;;  %vm5207_vm1 = vmmov 0  }
  0x24   :  { %v76_v5 = vsel %vm75_vm0, %v5332_v3, 0.0  ;;  %v79_v6 = vsel %vm75_vm0, %v5334_v4, 0.0  ;;  %4723 = vmatprep.subr.mxu0 %v122_v17  ;;  %v120_v19 = vld [vmem:[%s5993_s6 + $0x8] sm:$0xff]  ;;  %v119_v20 = vld [vmem:[%s5993_s6] sm:$0xff]  ;;  %4739 = vmatprep.subr.mxu1 %v5206_v37  ;;  %s5208_s26 = smov 96   ;;  %vm218_vm2 = vcmask 64512  }
  0x25   :  { %77 = vadd.xlane.f32.xlu0 %v76_v5  ;;  %4724 = vmatpush3.msra.mxu0 %v122_v17  ;;  %v4433_v28 = vld [vmem:[%s5991_s4] ss:$0 sm:$0xff]  ;;  %s6028_s28 = sld [smem:[#allocation11_spill]]  ;;  %s5209_s29 = smov 64   ;;  %vm4236_vm6 = vcmask 130048   ;;  %vm4312_vm7 = vcmask 254976  }
  0x26   :  { %4725 = vmatprep.subr.mxu0 %v121_v18  ;;  %v4434_v30 = vld [vmem:[%s5992_s5] ss:$0 sm:$0xff]  ;;  %4741 = vmatprep.mubr.msk.f32.mxu1 %vm5207_vm1, %v5206_v37  ;;  %s5210_s0 = smov 88   ;;  %s5211_s30 = smov 120   ;;  %vm4417_vm8 = vcmask 123904  }
  0x27   :  { %4726 = vmatpush3.msra.mxu0 %v121_v18  ;;  %v4435_v38 = vld [vmem:[%s5994_s7] ss:$0 sm:$0xff]  ;;  %s5212_s20 = smov 56   ;;  %s5213_s21 = smov 80  }
  0x28   :  { %4727 = vmatprep.subr.mxu0 %v120_v19  ;;  %s6018_s1 = smov 112   ;;  %s6016_s25 = smov 48  }
  0x29   :  { %80 = vadd.xlane.f32.xlu0 %v79_v6  ;;  %4728 = vmatpush3.msra.mxu0 %v120_v19  ;;  %s6014_s3 = smov 72   ;;  %s6012_s27 = smov 104  }
  0x2a   :  { %4729 = vmatprep.subr.mxu0 %v119_v20  ;;  %s6010_s2 = smov 40   ;;  %s6029_s13 = sld [smem:[#allocation12_spill]] }
  0x2b   :  { %4730 = vmatpush3.msra.mxu0 %v119_v20  ;;  %v5396_v46 = vld [vmem:[%s6028_s28] sm:$0xff]  ;;  %s6033_s23 = smov 104  }
  0x2c   :  { %4734 = vmatprep.subr.mxu0 %v5206_v37 }
  0xae   :  { %v78_v7 = vpop.xlane.xlu0 %77 }
  0xaf   :  { %v83_v8 = vmul.f32 0.03125, %v78_v7 }
  0xb1   :  { %v85_v9 = vsub.f32 %v5332_v3, %v83_v8 }
  0xb2   :  { %v81_v10 = vpop.xlane.xlu0 %80 }
  0xb3   :  { %v84_v11 = vmul.f32 0.03125, %v81_v10  ;;  %v87_v12 = vmul.f32 %v85_v9, %v85_v9 }
  0xb5   :  { %v86_v13 = vsub.f32 %v5334_v4, %v84_v11  ;;  %v89_v14 = vsel %vm75_vm0, %v87_v12, 0.0 }
  0xb6   :  { %90 = vadd.xlane.f32.xlu1 %v89_v14 }
  0xb7   :  { %v88_v15 = vmul.f32 %v86_v13, %v86_v13 }
  0xb9   :  { %v92_v16 = vsel %vm75_vm0, %v88_v15, 0.0 }
  0xba   :  { %93 = vadd.xlane.f32.xlu1 %v92_v16 }
 0x13f   :  { %v91_v21 = vpop.xlane.xlu1 %90 }
 0x140   :  { %v95_v22 = vmul.f32 0.03125, %v91_v21 }
 0x142   :  { %v97_v23 = vadd.f32 1e-05, %v95_v22 }
 0x143   :  { %v94_v24 = vpop.xlane.xlu1 %93 }
 0x144   :  { %5070 = vrsqrt.f32 %v97_v23  ;;  %v96_v25 = vmul.f32 0.03125, %v94_v24 }
 0x146   :  { %v98_v26 = vadd.f32 1e-05, %v96_v25 }
 0x148   :  { %5072 = vrsqrt.f32 %v98_v26 }
 0x151   :  { %v5071_v27 = vpop.eup %5070 }
 0x152   :  { %v101_v29 = vmul.f32 %v5071_v27, %v85_v9 }
 0x154   :  { %v109_v31 = vmul.f32 %v4433_v28, %v101_v29 }
 0x155   :  { %v5073_v32 = vpop.eup %5072 }
 0x156   :  { %v102_v33 = vmul.f32 %v5073_v32, %v86_v13  ;;  %v117_v34 = vadd.f32 %v4434_v30, %v109_v31 }
 0x158   :  { %v110_v35 = vmul.f32 %v4433_v28, %v102_v33  ;;  %4731 = vmatprep.mubr.msk.f32.mxu0 %vm75_vm0, %v117_v34 }
 0x15a   :  { %v118_v36 = vadd.f32 %v4434_v30, %v110_v35 }
 0x15c   :  { %4732 = vmatmul.mubr.msk.f32.vlgmr.msra.gmra.mxu0 %vm75_vm0, %v118_v36 }
 0x15d   :  { %4736 = vmatprep.mubr.msk.f32.mxu0 %vm5207_vm1, %v5206_v37 }
 0x21c   :  { %v4733_v39 = vpop.f32.mrf.mxu0 }
 0x21d   :  { %v5373_v40 = vadd.f32 %v4733_v39, %v4435_v38 }
 0x21e   :  { %v202_v41 = vpop.f32.mrf.mxu0 }
 0x21f   :  { %v5375_v42 = vadd.f32 %v4435_v38, %v202_v41  ;;  %294 = vrot.lane.b32.xlu1 %v5373_v40, %s5208_s26 }
 0x221   :  { %216 = vrot.lane.b32.xlu0 %v5375_v42, %s5208_s26 }
 0x291   :  { %v295_v43 = vpop.permute.xlu1 %294 }
 0x292   :  { %4740 = vmatpush3.xpose.msk.msra.mxu1 %vm218_vm2, %v295_v43 }
 0x293   :  { %v217_v44 = vpop.permute.xlu0 %216  ;;  %4749 = vmatprep.subr.mxu1 %v5206_v37 }
 0x294   :  { %4735 = vmatpush3.xpose.msk.msra.mxu0 %vm218_vm2, %v217_v44  ;;  %v211_v44 = vld [vmem:[%s5995_s8] sm:$0xff] }
 0x295   :  { %4742 = vmatmul.mubr.msk.f32.vlgmr.msra.gmra.mxu1 %vm218_vm2, %v5373_v40  ;;  %4744 = vmatprep.subr.mxu0 %v5206_v37 }
 0x296   :  { %4751 = vmatprep.mubr.msk.f32.mxu1 %vm5207_vm1, %v5206_v37 }
 0x297   :  { %4737 = vmatmul.mubr.msk.f32.vlgmr.msra.gmra.mxu0 %vm218_vm2, %v5375_v42 }
 0x298   :  { %4746 = vmatprep.mubr.msk.f32.mxu0 %vm5207_vm1, %v5206_v37 }
 0x355   :  { %v366_v45 = vpop.f32.mrf.mxu1 }
 0x356   :  { %v371_v47 = vmul.f32 0.35355338, %v366_v45 }
 0x357   :  { %v289_v48 = vpop.f32.mrf.mxu0  ;;  %v4743_v49 = vpop.f32.mrf.mxu1 }
 0x358   :  { %v370_v50 = vmul.f32 0.35355338, %v289_v48  ;;  %v373_v51 = vadd.f32 %v371_v47, %v5396_v46 }
 0x359   :  { %v4738_v52 = vpop.f32.mrf.mxu0 }
 0x35a   :  { %v377_v53 = vsel %vm218_vm2, %v373_v51, -inf  ;;  %v372_v54 = vadd.f32 %v370_v50, %v5396_v46 }
 0x35b   :  { %378 = vmax.xlane.f32.xlu0 %v377_v53 }
 0x35c   :  { %v374_v55 = vsel %vm218_vm2, %v372_v54, -inf }
 0x35d   :  { %375 = vmax.xlane.f32.xlu1 %v374_v55 }
 0x3e4   :  { %v379_v56 = vpop.xlane.xlu0 %378 }
 0x3e5   :  { %v381_v57 = vsub.f32 %v373_v51, %v379_v56  ;;  %v212_v56 = vld [vmem:[%s5995_s8 + $0x8] sm:$0xff] }
 0x3e6   :  { %v376_v58 = vpop.xlane.xlu1 %375 }
 0x3e7   :  { %v384_v59 = vmul.f32 1.442695, %v381_v57  ;;  %v380_v60 = vsub.f32 %v372_v54, %v376_v58 }
 0x3e9   :  { %5074 = vpow2.f32 %v384_v59  ;;  %v382_v61 = vmul.f32 1.442695, %v380_v60 }
 0x3eb   :  { %5076 = vpow2.f32 %v382_v61 }
 0x3f6   :  { %v5075_v62 = vpop.eup %5074 }
 0x3f7   :  { %v389_v63 = vsel %vm218_vm2, %v5075_v62, 0.0 }
 0x3f8   :  { %v5077_v0 = vpop.eup %5076  ;;  %390 = vadd.xlane.f32.xlu1 %v389_v63 }
 0x3f9   :  { %v386_v1 = vsel %vm218_vm2, %v5077_v0, 0.0 }
 0x3fa   :  { %387 = vadd.xlane.f32.xlu0 %v386_v1 }
 0x409   :  { %472 = vrot.lane.b32.xlu1 %v5373_v40, %s5209_s29 }
 0x40d   :  { %550 = vrot.lane.b32.xlu1 %v5375_v42, %s5210_s0 }
 0x410   :  { %396 = vrot.lane.b32.xlu0 %v5375_v42, %s5209_s29 }
 0x411   :  { %628 = vrot.lane.b32.xlu1 %v5373_v40, %s5210_s0 }
 0x414   :  { %548 = vrot.lane.b32.xlu0 %v5375_v42, %s5211_s30 }
 0x415   :  { %626 = vrot.lane.b32.xlu1 %v5373_v40, %s5211_s30 }
 0x481   :  { %v391_v2 = vpop.xlane.xlu1 %390 }
 0x482   :  { %5078 = vrcp.f32 %v391_v2 }
 0x483   :  { %v388_v5 = vpop.xlane.xlu0 %387 }
 0x484   :  { %5080 = vrcp.f32 %v388_v5 }
 0x485   :  { %v473_v6 = vpop.permute.xlu1 %472 }
 0x486   :  { %4750 = vmatpush3.msra.mxu1 %v473_v6 }
 0x487   :  { %v397_v7 = vpop.permute.xlu0 %396  ;;  %4759 = vmatprep.subr.mxu1 %v5206_v37 }
 0x488   :  { %4745 = vmatpush3.msra.mxu0 %v397_v7 }
 0x489   :  { %v551_v8 = vpop.permute.xlu1 %550  ;;  %4754 = vmatprep.subr.mxu0 %v5206_v37 }
 0x48b   :  { %v549_v15 = vpop.permute.xlu0 %548 }
 0x48d   :  { %v629_v10 = vpop.permute.xlu1 %628 }
 0x48f   :  { %v5079_v9 = vpop.eup %5078 }
 0x490   :  { %v395_v11 = vmul.f32 %v5079_v9, %v5075_v62 }
 0x491   :  { %v5081_v12 = vpop.eup %5080  ;;  %v627_v14 = vpop.permute.xlu1 %626 }
 0x492   :  { %4752 = vmatmul.mubr.msk.f32.vlgmr.msra.gmra.mxu1 %vm218_vm2, %v395_v11  ;;  %v394_v13 = vmul.f32 %v5081_v12, %v5077_v0 }
 0x493   :  { %4760 = vmatpush3.xpose.msk.msra.mxu1 %vm218_vm2, %v629_v10  ;;  %4761 = vmatprep.mubr.msk.f32.mxu1 %vm5207_vm1, %v5206_v37 }
 0x494   :  { %4747 = vmatmul.mubr.msk.f32.vlgmr.msra.gmra.mxu0 %vm218_vm2, %v394_v13  ;;  %4769 = vmatprep.subr.mxu1 %v5206_v37 }
 0x495   :  { %4755 = vmatpush3.xpose.msk.msra.mxu0 %vm218_vm2, %v551_v8  ;;  %4756 = vmatprep.mubr.msk.f32.mxu0 %vm5207_vm1, %v5206_v37 }
 0x496   :  { %4762 = vmatmul.mubr.msk.f32.vlgmr.msra.gmra.mxu1 %vm218_vm2, %v627_v14  ;;  %4764 = vmatprep.subr.mxu0 %v5206_v37 }
 0x497   :  { %4771 = vmatprep.mubr.msk.f32.mxu1 %vm5207_vm1, %v5206_v37 }
 0x498   :  { %4757 = vmatmul.mubr.msk.f32.vlgmr.msra.gmra.mxu0 %vm218_vm2, %v549_v15 }
 0x499   :  { %4766 = vmatprep.mubr.msk.f32.mxu0 %vm5207_vm1, %v5206_v37 }
 0x552   :  { %v544_v16 = vpop.f32.mrf.mxu1 }
 0x554   :  { %v468_v17 = vpop.f32.mrf.mxu0  ;;  %v4753_v18 = vpop.f32.mrf.mxu1 }
 0x556   :  { %v4748_v19 = vpop.f32.mrf.mxu0  ;;  %v700_v20 = vpop.f32.mrf.mxu1 }
 0x557   :  { %v705_v21 = vmul.f32 0.35355338, %v700_v20 }
 0x558   :  { %v622_v22 = vpop.f32.mrf.mxu0  ;;  %v4763_v23 = vpop.f32.mrf.mxu1 }
 0x559   :  { %v704_v24 = vmul.f32 0.35355338, %v622_v22  ;;  %v707_v25 = vadd.f32 %v705_v21, %v5396_v46 }
 0x55a   :  { %v4758_v26 = vpop.f32.mrf.mxu0 }
 0x55b   :  { %v711_v27 = vsel %vm218_vm2, %v707_v25, -inf  ;;  %v706_v28 = vadd.f32 %v704_v24, %v5396_v46 }
 0x55c   :  { %712 = vmax.xlane.f32.xlu1 %v711_v27 }
 0x55d   :  { %v708_v29 = vsel %vm218_vm2, %v706_v28, -inf }
 0x55e   :  { %709 = vmax.xlane.f32.xlu0 %v708_v29 }
 0x56d   :  { %806 = vrot.lane.b32.xlu1 %v5373_v40, %s5212_s20 }
 0x571   :  { %1046 = vrot.lane.b32.xlu1 %v5375_v42, %s5213_s21 }
 0x575   :  { %1124 = vrot.lane.b32.xlu1 %v5373_v40, %s5213_s21 }
 0x579   :  { %1122 = vrot.lane.b32.xlu1 %v5373_v40, %s6018_s1 }
 0x5e5   :  { %v713_v30 = vpop.xlane.xlu1 %712 }
 0x5e6   :  { %v715_v31 = vsub.f32 %v707_v25, %v713_v30 }
 0x5e7   :  { %v710_v32 = vpop.xlane.xlu0 %709 }
 0x5e8   :  { %v718_v33 = vmul.f32 1.442695, %v715_v31  ;;  %v714_v34 = vsub.f32 %v706_v28, %v710_v32 }
 0x5e9   :  { %v807_v35 = vpop.permute.xlu1 %806 }
 0x5ea   :  { %5082 = vpow2.f32 %v718_v33  ;;  %v716_v36 = vmul.f32 1.442695, %v714_v34  ;;  %4770 = vmatpush3.msra.mxu1 %v807_v35 }
 0x5eb   :  { %4779 = vmatprep.subr.mxu1 %v211_v44 }
 0x5ec   :  { %5084 = vpow2.f32 %v716_v36  ;;  %v213_v36 = vld [vmem:[%s5995_s8 + $0x10] sm:$0xff] }
 0x5ed   :  { %v1047_v49 = vpop.permute.xlu1 %1046 }
 0x5f1   :  { %v1125_v53 = vpop.permute.xlu1 %1124 }
 0x5f5   :  { %v1123_v55 = vpop.permute.xlu1 %1122 }
 0x5f7   :  { %v5083_v38 = vpop.eup %5082 }
 0x5f8   :  { %v723_v39 = vsel %vm218_vm2, %v5083_v38, 0.0 }
 0x5f9   :  { %v5085_v41 = vpop.eup %5084  ;;  %724 = vadd.xlane.f32.xlu0 %v723_v39 }
 0x5fa   :  { %v720_v43 = vsel %vm218_vm2, %v5085_v41, 0.0 }
 0x5fd   :  { %721 = vadd.xlane.f32.xlu0 %v720_v43 }
 0x613   :  { %730 = vrot.lane.b32.xlu0 %v5375_v42, %s5212_s20 }
 0x617   :  { %1044 = vrot.lane.b32.xlu0 %v5375_v42, %s6018_s1 }
 0x682   :  { %v725_v45 = vpop.xlane.xlu0 %724 }
 0x683   :  { %5086 = vrcp.f32 %v725_v45 }
 0x686   :  { %v722_v47 = vpop.xlane.xlu0 %721 }
 0x687   :  { %5088 = vrcp.f32 %v722_v47 }
 0x68a   :  { %v731_v48 = vpop.permute.xlu0 %730 }
 0x68b   :  { %4765 = vmatpush3.msra.mxu0 %v731_v48 }
 0x68c   :  { %4774 = vmatprep.subr.mxu0 %v212_v56 }
 0x68e   :  { %v1045_v0 = vpop.permute.xlu0 %1044 }
 0x690   :  { %v5087_v50 = vpop.eup %5086 }
 0x691   :  { %v729_v51 = vmul.f32 %v5087_v50, %v5083_v38 }
 0x693   :  { %4772 = vmatmul.mubr.msk.f32.vlgmr.msra.gmra.mxu1 %vm218_vm2, %v729_v51 }
 0x694   :  { %v5089_v52 = vpop.eup %5088  ;;  %4781 = vmatprep.mubr.msk.f32.mxu1 %vm218_vm2, %v468_v17  ;;  %4780 = vmatpush3.msra.mxu1 %v211_v44 }
 0x695   :  { %4789 = vmatprep.subr.mxu1 %v5206_v37  ;;  %v728_v54 = vmul.f32 %v5089_v52, %v5085_v41 }
 0x697   :  { %4767 = vmatmul.mubr.msk.f32.vlgmr.msra.gmra.mxu0 %vm218_vm2, %v728_v54  ;;  %4782 = vmatmul.mubr.msk.f32.vlgmr.msra.gmra.mxu1 %vm218_vm2, %v544_v16 }
 0x698   :  { %4790 = vmatpush3.xpose.msk.msra.mxu1 %vm218_vm2, %v1125_v53  ;;  %4791 = vmatprep.mubr.msk.f32.mxu1 %vm5207_vm1, %v5206_v37 }
 0x699   :  { %4799 = vmatprep.subr.mxu1 %v5206_v37  ;;  %4775 = vmatpush3.msra.mxu0 %v212_v56 }
 0x69a   :  { %4784 = vmatprep.subr.mxu0 %v5206_v37 }
 0x69b   :  { %4792 = vmatmul.mubr.msk.f32.vlgmr.msra.gmra.mxu1 %vm218_vm2, %v1123_v55 }
 0x69c   :  { %4801 = vmatprep.mubr.msk.f32.mxu1 %vm5207_vm1, %v5206_v37 }
 0x753   :  { %v878_v57 = vpop.f32.mrf.mxu1 }
 0x755   :  { %v4773_v58 = vpop.f32.mrf.mxu1 }
 0x757   :  { %v802_v59 = vpop.f32.mrf.mxu0  ;;  %v5471_v60 = vpop.f32.mrf.mxu1 }
 0x758   :  { %4776 = vmatprep.mubr.msk.f32.mxu0 %vm218_vm2, %v802_v59 }
 0x759   :  { %v4768_v61 = vpop.f32.mrf.mxu0  ;;  %4777 = vmatmul.mubr.msk.f32.vlgmr.msra.gmra.mxu0 %vm218_vm2, %v878_v57  ;;  %v5475_v62 = vpop.f32.mrf.mxu1 }
 0x75a   :  { %4785 = vmatpush3.xpose.msk.msra.mxu0 %vm218_vm2, %v1047_v49  ;;  %4786 = vmatprep.mubr.msk.f32.mxu0 %vm5207_vm1, %v5206_v37 }
 0x75b   :  { %v1196_v63 = vpop.f32.mrf.mxu1  ;;  %4794 = vmatprep.subr.mxu0 %v5206_v37 }
 0x75c   :  { %v1201_v1 = vmul.f32 0.35355338, %v1196_v63 }
 0x75d   :  { %4787 = vmatmul.mubr.msk.f32.vlgmr.msra.gmra.mxu0 %vm218_vm2, %v1045_v0  ;;  %v4793_v2 = vpop.f32.mrf.mxu1 }
 0x75e   :  { %v1203_v5 = vadd.f32 %v1201_v1, %v5396_v46  ;;  %4796 = vmatprep.mubr.msk.f32.mxu0 %vm5207_vm1, %v5206_v37 }
 0x760   :  { %v1207_v6 = vsel %vm218_vm2, %v1203_v5, -inf }
 0x761   :  { %1208 = vmax.xlane.f32.xlu1 %v1207_v6 }
 0x772   :  { %1302 = vrot.lane.b32.xlu1 %v5373_v40, %s6016_s25 }
 0x776   :  { %1463 = vrot.lane.b32.xlu1 %v5375_v42, %s6014_s3 }
 0x77a   :  { %1541 = vrot.lane.b32.xlu1 %v5373_v40, %s6014_s3 }
 0x77e   :  { %1539 = vrot.lane.b32.xlu1 %v5373_v40, %s6012_s27 }
 0x7ea   :  { %v1209_v7 = vpop.xlane.xlu1 %1208 }
 0x7eb   :  { %v1211_v9 = vsub.f32 %v1203_v5, %v1209_v7 }
 0x7ed   :  { %v1214_v10 = vmul.f32 1.442695, %v1211_v9 }
 0x7ee   :  { %v1303_v8 = vpop.permute.xlu1 %1302 }
 0x7ef   :  { %4800 = vmatpush3.msra.mxu1 %v1303_v8  ;;  %5090 = vpow2.f32 %v1214_v10 }
 0x7f0   :  { %4809 = vmatprep.subr.mxu1 %v5206_v37 }
 0x7f2   :  { %v1464_v28 = vpop.permute.xlu1 %1463 }
 0x7f6   :  { %v1542_v45 = vpop.permute.xlu1 %1541 }
 0x7fa   :  { %v1540_v49 = vpop.permute.xlu1 %1539 }
 0x7fc   :  { %v5091_v18 = vpop.eup %5090 }
 0x7fd   :  { %v1219_v19 = vsel %vm218_vm2, %v5091_v18, 0.0 }
 0x819   :  { %v5495_v11 = vpop.f32.mrf.mxu0 }
 0x81a   :  { %v1041_v55 = vadd.f32 %v5471_v60, %v5495_v11 }
 0x81b   :  { %v5497_v12 = vpop.f32.mrf.mxu0 }
 0x81c   :  { %v1036_v57 = vadd.f32 %v5475_v62, %v5497_v12 }
 0x81d   :  { %v1118_v13 = vpop.f32.mrf.mxu0 }
 0x81e   :  { %v1200_v14 = vmul.f32 0.35355338, %v1118_v13 }
 0x81f   :  { %v4788_v15 = vpop.f32.mrf.mxu0 }
 0x820   :  { %v1202_v16 = vadd.f32 %v1200_v14, %v5396_v46 }
 0x822   :  { %v1204_v17 = vsel %vm218_vm2, %v1202_v16, -inf }
 0x823   :  { %1205 = vmax.xlane.f32.xlu0 %v1204_v17 }
 0x827   :  { %1220 = vadd.xlane.f32.xlu0 %v1219_v19 }
 0x8ac   :  { %v1206_v20 = vpop.xlane.xlu0 %1205 }
 0x8ad   :  { %v1210_v21 = vsub.f32 %v1202_v16, %v1206_v20  ;;  %v214_v16 = vld [vmem:[%s5995_s8 + $0x18] sm:$0xff] }
 0x8af   :  { %v1212_v22 = vmul.f32 1.442695, %v1210_v21 }
 0x8b0   :  { %v1221_v23 = vpop.xlane.xlu0 %1220 }
 0x8b1   :  { %5092 = vpow2.f32 %v1212_v22  ;;  %v4470_v22 = vld [vmem:[%s5996_s9] ss:$0 sm:$0xff] }
 0x8b2   :  { %5094 = vrcp.f32 %v1221_v23 }
 0x8be   :  { %v5093_v24 = vpop.eup %5092 }
 0x8bf   :  { %v5095_v25 = vpop.eup %5094  ;;  %v1216_v26 = vsel %vm218_vm2, %v5093_v24, 0.0 }
 0x8c0   :  { %1217 = vadd.xlane.f32.xlu0 %v1216_v26  ;;  %v1225_v27 = vmul.f32 %v5095_v25, %v5091_v18 }
 0x8c2   :  { %4802 = vmatmul.mubr.msk.f32.vlgmr.msra.gmra.mxu1 %vm218_vm2, %v1225_v27 }
 0x8c3   :  { %4810 = vmatpush3.xpose.msk.msra.mxu1 %vm218_vm2, %v1464_v28  ;;  %4811 = vmatprep.mubr.msk.f32.mxu1 %vm5207_vm1, %v5206_v37 }
 0x8c4   :  { %4819 = vmatprep.subr.mxu1 %v5206_v37 }
 0x8d6   :  { %1226 = vrot.lane.b32.xlu0 %v5375_v42, %s6016_s25 }
 0x8da   :  { %1461 = vrot.lane.b32.xlu0 %v5375_v42, %s6012_s27  ;;  %s6034_s27 = smov 40  }
 0x949   :  { %v1218_v29 = vpop.xlane.xlu0 %1217 }
 0x94a   :  { %5096 = vrcp.f32 %v1218_v29 }
 0x94d   :  { %v1227_v30 = vpop.permute.xlu0 %1226 }
 0x94e   :  { %4795 = vmatpush3.msra.mxu0 %v1227_v30 }
 0x94f   :  { %4804 = vmatprep.subr.mxu0 %v213_v36 }
 0x951   :  { %v1462_v31 = vpop.permute.xlu0 %1461 }
 0x952   :  { %4812 = vmatmul.mubr.msk.f32.vlgmr.msra.gmra.mxu1 %vm218_vm2, %v1462_v31 }
 0x953   :  { %4821 = vmatprep.mubr.msk.f32.mxu1 %vm5207_vm1, %v5206_v37 }
 0x957   :  { %v5097_v32 = vpop.eup %5096 }
 0x958   :  { %v1224_v33 = vmul.f32 %v5097_v32, %v5093_v24 }
 0x95a   :  { %4797 = vmatmul.mubr.msk.f32.vlgmr.msra.gmra.mxu0 %vm218_vm2, %v1224_v33 }
 0x95b   :  { %4805 = vmatpush3.msra.mxu0 %v213_v36 }
 0x95c   :  { %4814 = vmatprep.subr.mxu0 %v5206_v37 }
 0x982   :  { %v1374_v34 = vpop.f32.mrf.mxu1 }
 0x984   :  { %v4803_v35 = vpop.f32.mrf.mxu1 }
 0xa12   :  { %v1535_v38 = vpop.f32.mrf.mxu1 }
 0xa13   :  { %v1617_v39 = vmul.f32 0.35355338, %v1535_v38 }
 0xa14   :  { %v4813_v41 = vpop.f32.mrf.mxu1 }
 0xa15   :  { %v1619_v43 = vadd.f32 %v1617_v39, %v5396_v46  ;;  %v1936_v41 = vld [vmem:[%s5999_s12 + $0x18] sm:$0xff] }
 0xa17   :  { %v1621_v44 = vsel %vm218_vm2, %v1619_v43, -inf }
 0xa18   :  { %1622 = vmax.xlane.f32.xlu0 %v1621_v44  ;;  %v1934_v44 = vld [vmem:[%s5999_s12 + $0x8] sm:$0xff] }
 0xa1a   :  { %v1298_v47 = vpop.f32.mrf.mxu0 }
 0xa1b   :  { %4806 = vmatprep.mubr.msk.f32.mxu0 %vm218_vm2, %v1298_v47 }
 0xa1c   :  { %v4798_v48 = vpop.f32.mrf.mxu0  ;;  %4807 = vmatmul.mubr.msk.f32.vlgmr.msra.gmra.mxu0 %vm218_vm2, %v1374_v34 }
 0xa1d   :  { %4815 = vmatpush3.xpose.msk.msra.mxu0 %vm218_vm2, %v1542_v45  ;;  %4816 = vmatprep.mubr.msk.f32.mxu0 %vm5207_vm1, %v5206_v37  ;;  %v1933_v45 = vld [vmem:[%s5999_s12] sm:$0xff] }
 0xa1e   :  { %4824 = vmatprep.subr.mxu0 %v5206_v37 }
 0xa20   :  { %4817 = vmatmul.mubr.msk.f32.vlgmr.msra.gmra.mxu0 %vm218_vm2, %v1540_v49 }
 0xa21   :  { %4826 = vmatprep.mubr.msk.f32.mxu0 %vm5207_vm1, %v5206_v37 }
 0xaa1   :  { %v1623_v50 = vpop.xlane.xlu0 %1622 }
 0xaa2   :  { %v1627_v51 = vsub.f32 %v1619_v43, %v1623_v50  ;;  %v1935_v43 = vld [vmem:[%s5999_s12 + $0x10] sm:$0xff] }
 0xaa4   :  { %v1629_v52 = vmul.f32 1.442695, %v1627_v51 }
 0xaa6   :  { %5098 = vpow2.f32 %v1629_v52 }
 0xab3   :  { %v5099_v53 = vpop.eup %5098 }
 0xab4   :  { %v1633_v54 = vsel %vm218_vm2, %v5099_v53, 0.0 }
 0xab5   :  { %1634 = vadd.xlane.f32.xlu0 %v1633_v54  ;;  %v4471_v54 = vld [vmem:[%s5997_s10] ss:$0 sm:$0xff] }
 0xadc   :  { %v4808_v56 = vpop.f32.mrf.mxu0 }
 0xadd   :  { %v1460_v58 = vadd.f32 %v4808_v56, %v1041_v55 }
 0xade   :  { %v1450_v59 = vpop.f32.mrf.mxu0 }
 0xadf   :  { %v1459_v61 = vadd.f32 %v1450_v59, %v1036_v57  ;;  %v4472_v59 = vld [vmem:[%s5998_s11] ss:$0 sm:$0xff] }
 0xae0   :  { %v1613_v63 = vpop.f32.mrf.mxu0 }
 0xae1   :  { %v1618_v0 = vmul.f32 0.35355338, %v1613_v63 }
 0xae2   :  { %v4818_v1 = vpop.f32.mrf.mxu0 }
 0xae3   :  { %v1620_v2 = vadd.f32 %v1618_v0, %v5396_v46  ;;  %v2056_v1 = vld [vmem:[%s6001_s14 + $0x78] sm:$0xff] }
 0xae5   :  { %v1624_v5 = vsel %vm218_vm2, %v1620_v2, -inf }
 0xae6   :  { %1625 = vmax.xlane.f32.xlu1 %v1624_v5  ;;  %v2054_v5 = vld [vmem:[%s6001_s14 + $0x68] sm:$0xff] }
 0xaf7   :  { %1719 = vrot.lane.b32.xlu1 %v5373_v40, %s6010_s2 }
 0xb3e   :  { %v1635_v10 = vpop.xlane.xlu0 %1634 }
 0xb6f   :  { %v1626_v60 = vpop.xlane.xlu1 %1625 }
 0xb70   :  { %v1628_v6 = vsub.f32 %v1620_v2, %v1626_v60  ;;  %v2055_v2 = vld [vmem:[%s6001_s14 + $0x70] sm:$0xff]  ;;  %v2053_v60 = vld [vmem:[%s6001_s14 + $0x60] sm:$0xff] }
 0xb72   :  { %v1631_v7 = vmul.f32 1.442695, %v1628_v6  ;;  %v2052_v6 = vld [vmem:[%s6001_s14 + $0x58] sm:$0xff] }
 0xb73   :  { %v1720_v8 = vpop.permute.xlu1 %1719 }
 0xb74   :  { %5100 = vpow2.f32 %v1631_v7  ;;  %4825 = vmatpush3.msra.mxu0 %v1720_v8  ;;  %v2051_v7 = vld [vmem:[%s6001_s14 + $0x50] sm:$0xff]  ;;  %v2050_v8 = vld [vmem:[%s6001_s14 + $0x48] sm:$0xff] }
 0xb75   :  { %5102 = vrcp.f32 %v1635_v10  ;;  %4834 = vmatprep.subr.mxu0 %v1936_v41  ;;  %v2047_v10 = vld [vmem:[%s6001_s14 + $0x30] sm:$0xff] }
 0xb81   :  { %v5101_v62 = vpop.eup %5100 }
 0xb82   :  { %v1636_v9 = vsel %vm218_vm2, %v5101_v62, 0.0  ;;  %v5103_v12 = vpop.eup %5102 }
 0xb83   :  { %1637 = vadd.xlane.f32.xlu0 %v1636_v9  ;;  %v1641_v40 = vmul.f32 %v5103_v12, %v5099_v53  ;;  %v2048_v9 = vld [vmem:[%s6001_s14 + $0x38] sm:$0xff]  ;;  %v2045_v12 = vld [vmem:[%s6001_s14 + $0x20] sm:$0xff] }
 0xb99   :  { %1643 = vrot.lane.b32.xlu0 %v5375_v42, %s6010_s2 }
 0xc0c   :  { %v1638_v11 = vpop.xlane.xlu0 %1637 }
 0xc0d   :  { %5104 = vrcp.f32 %v1638_v11  ;;  %v2046_v11 = vld [vmem:[%s6001_s14 + $0x28] sm:$0xff] }
 0xc10   :  { %v1644_v13 = vpop.permute.xlu0 %1643 }
 0xc11   :  { %4820 = vmatpush3.msra.mxu1 %v1644_v13  ;;  %v2044_v13 = vld [vmem:[%s6001_s14 + $0x18] sm:$0xff] }
 0xc12   :  { %4822 = vmatmul.mubr.msk.f32.vlgmr.msra.gmra.mxu1 %vm218_vm2, %v1641_v40  ;;  %4829 = vmatprep.subr.mxu1 %v214_v16  ;;  %v2043_v40 = vld [vmem:[%s6001_s14 + $0x10] sm:$0xff] }
 0xc13   :  { %4830 = vmatpush3.msra.mxu1 %v214_v16  ;;  %v4473_v16 = vld [vmem:[%s6029_s13] ss:$0 sm:$0xff] }
 0xc14   :  { %4845 = vmatprep.subr.mxu1 %v2056_v1 }
 0xc1a   :  { %v5105_v14 = vpop.eup %5104 }
 0xc1b   :  { %v1642_v15 = vmul.f32 %v5105_v14, %v5101_v62  ;;  %v2049_v62 = vld [vmem:[%s6001_s14 + $0x40] sm:$0xff]  ;;  %v2042_v14 = vld [vmem:[%s6001_s14 + $0x8] sm:$0xff] }
 0xc1d   :  { %4827 = vmatmul.mubr.msk.f32.vlgmr.msra.gmra.mxu0 %vm218_vm2, %v1642_v15  ;;  %v2041_v15 = vld [vmem:[%s6001_s14] sm:$0xff] }
 0xc1e   :  { %4835 = vmatpush3.msra.mxu0 %v1936_v41 }
 0xc1f   :  { %4836 = vmatprep.subr.mxu0 %v1935_v43 }
 0xc20   :  { %4837 = vmatpush3.msra.mxu0 %v1935_v43 }
 0xc21   :  { %4838 = vmatprep.subr.mxu0 %v1934_v44 }
 0xc22   :  { %4839 = vmatpush3.msra.mxu0 %v1934_v44 }
 0xc23   :  { %4840 = vmatprep.subr.mxu0 %v1933_v45 }
 0xc24   :  { %4841 = vmatpush3.msra.mxu0 %v1933_v45 }
 0xcd2   :  { %v1715_v42 = vpop.f32.mrf.mxu1 }
 0xcd3   :  { %4831 = vmatprep.mubr.msk.f32.mxu1 %vm218_vm2, %v1715_v42 }
 0xcd4   :  { %v4823_v17 = vpop.f32.mrf.mxu1 }
 0xcdd   :  { %v1791_v18 = vpop.f32.mrf.mxu0 }
 0xcde   :  { %4832 = vmatmul.mubr.msk.f32.vlgmr.msra.gmra.mxu1 %vm218_vm2, %v1791_v18 }
 0xcdf   :  { %v4828_v19 = vpop.f32.mrf.mxu0  ;;  %4846 = vmatpush3.msra.mxu1 %v2056_v1 }
 0xce0   :  { %4847 = vmatprep.subr.mxu1 %v2055_v2 }
 0xce1   :  { %4848 = vmatpush3.msra.mxu1 %v2055_v2  ;;  %v4481_v2 = vld [vmem:[%s5991_s4 + $0x1] ss:$0 sm:$0xff] }
 0xce2   :  { %4849 = vmatprep.subr.mxu1 %v2054_v5 }
 0xce3   :  { %4850 = vmatpush3.msra.mxu1 %v2054_v5 }
 0xce4   :  { %4851 = vmatprep.subr.mxu1 %v2053_v60 }
 0xce5   :  { %4852 = vmatpush3.msra.mxu1 %v2053_v60 }
 0xce6   :  { %4853 = vmatprep.subr.mxu1 %v2052_v6 }
 0xce7   :  { %4854 = vmatpush3.msra.mxu1 %v2052_v6 }
 0xce8   :  { %4855 = vmatprep.subr.mxu1 %v2051_v7 }
 0xce9   :  { %4856 = vmatpush3.msra.mxu1 %v2051_v7 }
 0xcea   :  { %4857 = vmatprep.subr.mxu1 %v2050_v8 }
 0xceb   :  { %4858 = vmatpush3.msra.mxu1 %v2050_v8  ;;  %v4482_v8 = vld [vmem:[%s5992_s5 + $0x1] ss:$0 sm:$0xff] }
 0xcec   :  { %4859 = vmatprep.subr.mxu1 %v2049_v62 }
 0xced   :  { %4860 = vmatpush3.msra.mxu1 %v2049_v62 }
 0xcee   :  { %4861 = vmatprep.subr.mxu1 %v2048_v9 }
 0xcef   :  { %4862 = vmatpush3.msra.mxu1 %v2048_v9 }
 0xcf0   :  { %4863 = vmatprep.subr.mxu1 %v2047_v10 }
 0xcf1   :  { %4864 = vmatpush3.msra.mxu1 %v2047_v10 }
 0xcf2   :  { %4865 = vmatprep.subr.mxu1 %v2046_v11 }
 0xcf3   :  { %4866 = vmatpush3.msra.mxu1 %v2046_v11  ;;  %v4488_v11 = vld [vmem:[%s5994_s7 + $0x1] ss:$0 sm:$0xff] }
 0xcf4   :  { %4867 = vmatprep.subr.mxu1 %v2045_v12 }
 0xcf5   :  { %4868 = vmatpush3.msra.mxu1 %v2045_v12 }
 0xcf6   :  { %4869 = vmatprep.subr.mxu1 %v2044_v13 }
 0xcf7   :  { %4870 = vmatpush3.msra.mxu1 %v2044_v13 }
 0xcf8   :  { %4871 = vmatprep.subr.mxu1 %v2043_v40 }
 0xcf9   :  { %4872 = vmatpush3.msra.mxu1 %v2043_v40 }
 0xcfa   :  { %4873 = vmatprep.subr.mxu1 %v2042_v14 }
 0xcfb   :  { %4874 = vmatpush3.msra.mxu1 %v2042_v14 }
 0xcfc   :  { %4875 = vmatprep.subr.mxu1 %v2041_v15 }
 0xcfd   :  { %4876 = vmatpush3.msra.mxu1 %v2041_v15 }
 0xcfe   :  { %4916 = vmatprep.subr.mxu1 %v5206_v37 }
 0xd9e   :  { %v4833_v20 = vpop.f32.mrf.mxu1 }
 0xd9f   :  { %v1877_v21 = vadd.f32 %v4833_v20, %v1460_v58 }
 0xda0   :  { %v1867_v23 = vpop.f32.mrf.mxu1 }
 0xda1   :  { %v1879_v24 = vadd.f32 %v1877_v21, %v5334_v4  ;;  %v1876_v25 = vadd.f32 %v1867_v23, %v1459_v61 }
 0xda3   :  { %v5554_v26 = vadd.f32 %v4470_v22, %v1879_v24  ;;  %v1878_v27 = vadd.f32 %v1876_v25, %v5332_v3 }
 0xda5   :  { %v5557_v28 = vadd.f32 %v4470_v22, %v1878_v27  ;;  %v1894_v29 = vsel %vm75_vm0, %v5554_v26, 0.0 }
 0xda6   :  { %1895 = vadd.xlane.f32.xlu0 %v1894_v29 }
 0xda7   :  { %v1891_v30 = vsel %vm75_vm0, %v5557_v28, 0.0 }
 0xda8   :  { %1892 = vadd.xlane.f32.xlu1 %v1891_v30 }
 0xe2f   :  { %v1896_v31 = vpop.xlane.xlu0 %1895 }
 0xe30   :  { %v1898_v32 = vmul.f32 0.03125, %v1896_v31 }
 0xe31   :  { %v1893_v33 = vpop.xlane.xlu1 %1892 }
 0xe32   :  { %v1900_v4 = vsub.f32 %v5554_v26, %v1898_v32  ;;  %v1897_v34 = vmul.f32 0.03125, %v1893_v33 }
 0xe34   :  { %v1899_v35 = vsub.f32 %v5557_v28, %v1897_v34  ;;  %v1902_v36 = vmul.f32 %v1900_v4, %v1900_v4 }
 0xe36   :  { %v1906_v3 = vsel %vm75_vm0, %v1902_v36, 0.0  ;;  %v1901_v38 = vmul.f32 %v1899_v35, %v1899_v35 }
 0xe37   :  { %1907 = vadd.xlane.f32.xlu1 %v1906_v3 }
 0xe38   :  { %v1903_v39 = vsel %vm75_vm0, %v1901_v38, 0.0 }
 0xe39   :  { %1904 = vadd.xlane.f32.xlu0 %v1903_v39 }
 0xec0   :  { %v1908_v47 = vpop.xlane.xlu1 %1907 }
 0xec1   :  { %v1910_v48 = vmul.f32 0.03125, %v1908_v47 }
 0xec2   :  { %v1905_v49 = vpop.xlane.xlu0 %1904 }
 0xec3   :  { %v1912_v50 = vadd.f32 1e-05, %v1910_v48  ;;  %v1909_v51 = vmul.f32 0.03125, %v1905_v49 }
 0xec5   :  { %5106 = vrsqrt.f32 %v1912_v50  ;;  %v1911_v52 = vadd.f32 1e-05, %v1909_v51 }
 0xec7   :  { %5108 = vrsqrt.f32 %v1911_v52 }
 0xed2   :  { %v5107_v53 = vpop.eup %5106 }
 0xed3   :  { %v1916_v55 = vmul.f32 %v5107_v53, %v1900_v4  ;;  %v4478_v4 = vld [vmem:[%s6002_s15] ss:$0 sm:$0xff]  ;;  %v4486_v53 = vld [vmem:[%s5993_s6 + $0x38] sm:$0xff] }
 0xed4   :  { %v5109_v56 = vpop.eup %5108  ;;  %4880 = vmatprep.subr.mxu0 %v4486_v53 }
 0xed5   :  { %v1915_v57 = vmul.f32 %v5109_v56, %v1899_v35  ;;  %v1924_v58 = vmul.f32 %v4471_v54, %v1916_v55  ;;  %v4484_v55 = vld [vmem:[%s5993_s6 + $0x28] sm:$0xff]  ;;  %v4483_v56 = vld [vmem:[%s5993_s6 + $0x20] sm:$0xff] }
 0xed7   :  { %v1923_v61 = vmul.f32 %v4471_v54, %v1915_v57  ;;  %v1932_v0 = vadd.f32 %v4472_v59, %v1924_v58  ;;  %v4485_v54 = vld [vmem:[%s5993_s6 + $0x30] sm:$0xff] }
 0xed9   :  { %v1931_v63 = vadd.f32 %v4472_v59, %v1923_v61 }
 0xedb   :  { %4842 = vmatprep.mubr.msk.f32.mxu0 %vm75_vm0, %v1931_v63 }
 0xedc   :  { %4843 = vmatmul.mubr.msk.f32.vlgmr.msra.gmra.mxu0 %vm75_vm0, %v1932_v0 }
 0xedd   :  { %4881 = vmatpush3.msra.mxu0 %v4486_v53 }
 0xede   :  { %4882 = vmatprep.subr.mxu0 %v4485_v54 }
 0xedf   :  { %4883 = vmatpush3.msra.mxu0 %v4485_v54  ;;  %v5743_v54 = vld [vmem:[%s6028_s28] sm:$0xff] }
 0xee0   :  { %4884 = vmatprep.subr.mxu0 %v4484_v55 }
 0xee1   :  { %4885 = vmatpush3.msra.mxu0 %v4484_v55 }
 0xee2   :  { %4886 = vmatprep.subr.mxu0 %v4483_v56 }
 0xee3   :  { %4887 = vmatpush3.msra.mxu0 %v4483_v56 }
 0xee4   :  { %4891 = vmatprep.subr.mxu0 %v5206_v37 }
 0xf9c   :  { %v4844_v42 = vpop.f32.mrf.mxu0 }
 0xf9d   :  { %v2022_v17 = vadd.f32 %v4844_v42, %v4473_v16 }
 0xf9e   :  { %v2016_v18 = vpop.f32.mrf.mxu0 }
 0xf9f   :  { %v4477_v19 = vmul.f32 -1.702, %v2022_v17  ;;  %v2017_v20 = vadd.f32 %v4473_v16, %v2016_v18 }
 0xfa1   :  { %v2031_v21 = vmul.f32 1.442695, %v4477_v19  ;;  %v4476_v22 = vmul.f32 -1.702, %v2017_v20 }
 0xfa3   :  { %5110 = vpow2.f32 %v2031_v21  ;;  %v2029_v23 = vmul.f32 1.442695, %v4476_v22 }
 0xfa5   :  { %5112 = vpow2.f32 %v2029_v23 }
 0xfb0   :  { %v5111_v24 = vpop.eup %5110 }
 0xfb1   :  { %v2034_v25 = vadd.f32 1.0, %v5111_v24 }
 0xfb2   :  { %v5113_v27 = vpop.eup %5112 }
 0xfb3   :  { %v2033_v29 = vadd.f32 1.0, %v5113_v27  ;;  %5114 = vrcp.f32 %v2034_v25 }
 0xfb5   :  { %5116 = vrcp.f32 %v2033_v29 }
 0xfc0   :  { %v5115_v30 = vpop.eup %5114 }
 0xfc1   :  { %v2040_v33 = vmul.f32 %v5115_v30, %v2022_v17 }
 0xfc2   :  { %v5117_v31 = vpop.eup %5116 }
 0xfc3   :  { %v2039_v32 = vmul.f32 %v5117_v31, %v2017_v20 }
 0xfc5   :  { %4877 = vmatprep.mubr.f32.mxu1 %v2039_v32 }
 0xfc6   :  { %4878 = vmatmul.mubr.f32.vlgmr.msra.gmra.mxu1 %v2040_v33 }
 0xfc7   :  { %4918 = vmatprep.mubr.msk.f32.mxu1 %vm5207_vm1, %v5206_v37 }
0x1086   :  { %v4879_v34 = vpop.f32.mrf.mxu1 }
0x1087   :  { %v2136_v35 = vadd.f32 %v4879_v34, %v4478_v4 }
0x1088   :  { %v2130_v36 = vpop.f32.mrf.mxu1 }
0x1089   :  { %v5645_v3 = vadd.f32 %v2136_v35, %v5554_v26  ;;  %v2131_v38 = vadd.f32 %v4478_v4, %v2130_v36 }
0x108b   :  { %v5648_v39 = vadd.f32 %v2131_v38, %v5557_v28  ;;  %v2148_v41 = vsel %vm75_vm0, %v5645_v3, 0.0 }
0x108c   :  { %2149 = vadd.xlane.f32.xlu1 %v2148_v41 }
0x108d   :  { %v2145_v43 = vsel %vm75_vm0, %v5648_v39, 0.0 }
0x108e   :  { %2146 = vadd.xlane.f32.xlu0 %v2145_v43 }
0x1115   :  { %v2150_v44 = vpop.xlane.xlu1 %2149 }
0x1116   :  { %v2152_v45 = vmul.f32 0.03125, %v2150_v44 }
0x1117   :  { %v2147_v47 = vpop.xlane.xlu0 %2146 }
0x1118   :  { %v2154_v48 = vsub.f32 %v5645_v3, %v2152_v45  ;;  %v2151_v49 = vmul.f32 0.03125, %v2147_v47 }
0x111a   :  { %v2153_v26 = vsub.f32 %v5648_v39, %v2151_v49  ;;  %v2156_v50 = vmul.f32 %v2154_v48, %v2154_v48 }
0x111c   :  { %v2160_v28 = vsel %vm75_vm0, %v2156_v50, 0.0  ;;  %v2155_v51 = vmul.f32 %v2153_v26, %v2153_v26 }
0x111d   :  { %2161 = vadd.xlane.f32.xlu1 %v2160_v28 }
0x111e   :  { %v2157_v52 = vsel %vm75_vm0, %v2155_v51, 0.0 }
0x111f   :  { %2158 = vadd.xlane.f32.xlu0 %v2157_v52 }
0x11a6   :  { %v2162_v57 = vpop.xlane.xlu1 %2161 }
0x11a7   :  { %v2164_v58 = vmul.f32 0.03125, %v2162_v57 }
0x11a8   :  { %v2159_v59 = vpop.xlane.xlu0 %2158 }
0x11a9   :  { %v2166_v61 = vadd.f32 1e-05, %v2164_v58  ;;  %v2163_v63 = vmul.f32 0.03125, %v2159_v59 }
0x11ab   :  { %5118 = vrsqrt.f32 %v2166_v61  ;;  %v2165_v0 = vadd.f32 1e-05, %v2163_v63 }
0x11ad   :  { %5120 = vrsqrt.f32 %v2165_v0 }
0x11b8   :  { %v5119_v1 = vpop.eup %5118 }
0x11b9   :  { %v2170_v5 = vmul.f32 %v5119_v1, %v2154_v48 }
0x11ba   :  { %v5121_v60 = vpop.eup %5120 }
0x11bb   :  { %v2169_v6 = vmul.f32 %v5121_v60, %v2153_v26  ;;  %v2178_v7 = vmul.f32 %v4481_v2, %v2170_v5 }
0x11bd   :  { %v2177_v62 = vmul.f32 %v4481_v2, %v2169_v6  ;;  %v2186_v10 = vadd.f32 %v4482_v8, %v2178_v7 }
0x11bf   :  { %v2185_v9 = vadd.f32 %v4482_v8, %v2177_v62 }
0x11c1   :  { %4888 = vmatprep.mubr.msk.f32.mxu0 %vm75_vm0, %v2185_v9 }
0x11c2   :  { %4889 = vmatmul.mubr.msk.f32.vlgmr.msra.gmra.mxu0 %vm75_vm0, %v2186_v10 }
0x11c3   :  { %4893 = vmatprep.mubr.msk.f32.mxu0 %vm5207_vm1, %v5206_v37 }
0x1282   :  { %v4890_v12 = vpop.f32.mrf.mxu0 }
0x1283   :  { %v5684_v13 = vadd.f32 %v4890_v12, %v4488_v11 }
0x1284   :  { %v2272_v40 = vpop.f32.mrf.mxu0 }
0x1285   :  { %v5686_v14 = vadd.f32 %v4488_v11, %v2272_v40  ;;  %2364 = vrot.lane.b32.xlu1 %v5684_v13, %s5208_s26 }
0x1287   :  { %2287 = vrot.lane.b32.xlu0 %v5686_v14, %s5208_s26  ;;  %s6030_s26 = smov 112  }
0x12f7   :  { %v2365_v16 = vpop.permute.xlu1 %2364 }
0x12f9   :  { %v2288_v15 = vpop.permute.xlu0 %2287 }
0x12fa   :  { %4892 = vmatpush3.xpose.msk.msra.mxu0 %vm218_vm2, %v2288_v15 }
0x12fb   :  { %4896 = vmatprep.subr.mxu0 %v5206_v37 }
0x12fd   :  { %4894 = vmatmul.mubr.msk.f32.vlgmr.msra.gmra.mxu0 %vm218_vm2, %v5686_v14 }
0x12fe   :  { %4897 = vmatpush3.xpose.msk.msra.mxu0 %vm218_vm2, %v2365_v16  ;;  %4898 = vmatprep.mubr.msk.f32.mxu0 %vm5207_vm1, %v5206_v37  ;;  %v4491_v16 = vld [vmem:[%s5995_s8 + $0x20] sm:$0xff] }
0x12ff   :  { %4901 = vmatprep.subr.mxu0 %v5206_v37 }
0x1301   :  { %4899 = vmatmul.mubr.msk.f32.vlgmr.msra.gmra.mxu0 %vm218_vm2, %v5684_v13 }
0x1302   :  { %4903 = vmatprep.mubr.msk.f32.mxu0 %vm5207_vm1, %v5206_v37 }
0x13bd   :  { %v2359_v42 = vpop.f32.mrf.mxu0 }
0x13be   :  { %v2440_v17 = vmul.f32 0.35355338, %v2359_v42 }
0x13bf   :  { %v4895_v18 = vpop.f32.mrf.mxu0 }
0x13c0   :  { %v2442_v19 = vadd.f32 %v2440_v17, %v5396_v46 }
0x13c1   :  { %v2436_v20 = vpop.f32.mrf.mxu0 }
0x13c2   :  { %v2441_v21 = vmul.f32 0.35355338, %v2436_v20  ;;  %v2444_v22 = vsel %vm218_vm2, %v2442_v19, -inf }
0x13c3   :  { %2445 = vmax.xlane.f32.xlu1 %v2444_v22  ;;  %v4900_v23 = vpop.f32.mrf.mxu0 }
0x13c4   :  { %v2443_v24 = vadd.f32 %v2441_v21, %v5396_v46 }
0x13c6   :  { %v2447_v25 = vsel %vm218_vm2, %v2443_v24, -inf }
0x13c7   :  { %2448 = vmax.xlane.f32.xlu0 %v2447_v25 }
0x13d4   :  { %2542 = vrot.lane.b32.xlu1 %v5684_v13, %s5209_s29 }
0x13d8   :  { %2620 = vrot.lane.b32.xlu1 %v5686_v14, %s5210_s0 }
0x13dc   :  { %2698 = vrot.lane.b32.xlu1 %v5684_v13, %s5210_s0 }
0x144c   :  { %v2446_v27 = vpop.xlane.xlu1 %2445 }
0x144d   :  { %v2450_v29 = vsub.f32 %v2442_v19, %v2446_v27  ;;  %v4492_v27 = vld [vmem:[%s5995_s8 + $0x28] sm:$0xff] }
0x144f   :  { %v2452_v30 = vmul.f32 1.442695, %v2450_v29 }
0x1450   :  { %v2543_v31 = vpop.permute.xlu1 %2542  ;;  %v2449_v32 = vpop.xlane.xlu0 %2448 }
0x1451   :  { %5122 = vpow2.f32 %v2452_v30  ;;  %v2451_v33 = vsub.f32 %v2443_v24, %v2449_v32 }
0x1453   :  { %v2454_v46 = vmul.f32 1.442695, %v2451_v33 }
0x1454   :  { %v2621_v4 = vpop.permute.xlu1 %2620 }
0x1455   :  { %5124 = vpow2.f32 %v2454_v46 }
0x1458   :  { %v2699_v34 = vpop.permute.xlu1 %2698 }
0x1459   :  { %4917 = vmatpush3.xpose.msk.msra.mxu1 %vm218_vm2, %v2699_v34 }
0x145a   :  { %4926 = vmatprep.subr.mxu1 %v5206_v37 }
0x145e   :  { %v5123_v35 = vpop.eup %5122 }
0x145f   :  { %v2456_v36 = vsel %vm218_vm2, %v5123_v35, 0.0 }
0x1460   :  { %2457 = vadd.xlane.f32.xlu0 %v2456_v36 }
0x1462   :  { %v5125_v38 = vpop.eup %5124 }
0x1463   :  { %v2459_v41 = vsel %vm218_vm2, %v5125_v38, 0.0 }
0x1464   :  { %2460 = vadd.xlane.f32.xlu1 %v2459_v41 }
0x1475   :  { %2696 = vrot.lane.b32.xlu1 %v5684_v13, %s5211_s30 }
0x1476   :  { %2466 = vrot.lane.b32.xlu0 %v5686_v14, %s5209_s29 }
0x147a   :  { %2618 = vrot.lane.b32.xlu0 %v5686_v14, %s5211_s30 }
0x14e9   :  { %v2458_v43 = vpop.xlane.xlu0 %2457 }
0x14ea   :  { %5126 = vrcp.f32 %v2458_v43 }
0x14ed   :  { %v2461_v44 = vpop.xlane.xlu1 %2460  ;;  %v2467_v45 = vpop.permute.xlu0 %2466 }
0x14ee   :  { %5128 = vrcp.f32 %v2461_v44  ;;  %4902 = vmatpush3.msra.mxu0 %v2467_v45 }
0x14ef   :  { %4906 = vmatprep.subr.mxu0 %v5206_v37 }
0x14f1   :  { %v2697_v47 = vpop.permute.xlu1 %2696  ;;  %v2619_v28 = vpop.permute.xlu0 %2618 }
0x14f2   :  { %4919 = vmatmul.mubr.msk.f32.vlgmr.msra.gmra.mxu1 %vm218_vm2, %v2697_v47 }
0x14f3   :  { %4928 = vmatprep.mubr.msk.f32.mxu1 %vm5207_vm1, %v5206_v37 }
0x14f7   :  { %v5127_v48 = vpop.eup %5126 }
0x14f8   :  { %v2464_v49 = vmul.f32 %v5127_v48, %v5123_v35 }
0x14fa   :  { %4904 = vmatmul.mubr.msk.f32.vlgmr.msra.gmra.mxu0 %vm218_vm2, %v2464_v49 }
0x14fb   :  { %v5129_v26 = vpop.eup %5128  ;;  %4907 = vmatpush3.msra.mxu0 %v2543_v31  ;;  %4908 = vmatprep.mubr.msk.f32.mxu0 %vm5207_vm1, %v5206_v37 }
0x14fc   :  { %4911 = vmatprep.subr.mxu0 %v5206_v37  ;;  %v2465_v50 = vmul.f32 %v5129_v26, %v5125_v38 }
0x14fe   :  { %4909 = vmatmul.mubr.msk.f32.vlgmr.msra.gmra.mxu0 %vm218_vm2, %v2465_v50 }
0x14ff   :  { %4912 = vmatpush3.xpose.msk.msra.mxu0 %vm218_vm2, %v2621_v4  ;;  %4913 = vmatprep.mubr.msk.f32.mxu0 %vm5207_vm1, %v5206_v37 }
0x1500   :  { %4921 = vmatprep.subr.mxu0 %v5206_v37 }
0x1502   :  { %4914 = vmatmul.mubr.msk.f32.vlgmr.msra.gmra.mxu0 %vm218_vm2, %v2619_v28 }
0x1503   :  { %4923 = vmatprep.mubr.msk.f32.mxu0 %vm5207_vm1, %v5206_v37 }
0x15b2   :  { %v2770_v51 = vpop.f32.mrf.mxu1 }
0x15b3   :  { %v2775_v52 = vmul.f32 0.35355338, %v2770_v51 }
0x15b4   :  { %v4920_v53 = vpop.f32.mrf.mxu1 }
0x15b5   :  { %v2777_v55 = vadd.f32 %v5743_v54, %v2775_v52 }
0x15b7   :  { %v2781_v56 = vsel %vm218_vm2, %v2777_v55, -inf }
0x15b8   :  { %2782 = vmax.xlane.f32.xlu1 %v2781_v56 }
0x15ba   :  { %v2538_v57 = vpop.f32.mrf.mxu0 }
0x15bc   :  { %v4905_v58 = vpop.f32.mrf.mxu0 }
0x15be   :  { %v2614_v59 = vpop.f32.mrf.mxu0 }
0x15c0   :  { %v4910_v61 = vpop.f32.mrf.mxu0 }
0x15c2   :  { %v2692_v63 = vpop.f32.mrf.mxu0 }
0x15c3   :  { %v2774_v0 = vmul.f32 0.35355338, %v2692_v63 }
0x15c4   :  { %v4915_v1 = vpop.f32.mrf.mxu0 }
0x15c5   :  { %v2776_v2 = vadd.f32 %v5743_v54, %v2774_v0 }
0x15c7   :  { %v2778_v5 = vsel %vm218_vm2, %v2776_v2, -inf }
0x15c8   :  { %2779 = vmax.xlane.f32.xlu0 %v2778_v5 }
0x15c9   :  { %2876 = vrot.lane.b32.xlu1 %v5684_v13, %s5212_s20 }
0x15cd   :  { %3116 = vrot.lane.b32.xlu1 %v5686_v14, %s5213_s21 }
0x15d1   :  { %3194 = vrot.lane.b32.xlu1 %v5684_v13, %s5213_s21  ;;  %s6032_s21 = smov 72  }
0x15d5   :  { %3192 = vrot.lane.b32.xlu1 %v5684_v13, %s6030_s26 }
0x1641   :  { %v2783_v60 = vpop.xlane.xlu1 %2782 }
0x1642   :  { %v2785_v6 = vsub.f32 %v2777_v55, %v2783_v60 }
0x1644   :  { %v2788_v7 = vmul.f32 1.442695, %v2785_v6 }
0x1645   :  { %v2877_v8 = vpop.permute.xlu1 %2876 }
0x1646   :  { %5130 = vpow2.f32 %v2788_v7  ;;  %4927 = vmatpush3.msra.mxu1 %v2877_v8 }
0x1647   :  { %4936 = vmatprep.subr.mxu1 %v4491_v16 }
0x1649   :  { %v3117_v17 = vpop.permute.xlu1 %3116 }
0x164d   :  { %v3195_v21 = vpop.permute.xlu1 %3194 }
0x1651   :  { %v2780_v62 = vpop.xlane.xlu0 %2779  ;;  %v3193_v23 = vpop.permute.xlu1 %3192 }
0x1652   :  { %v2784_v9 = vsub.f32 %v2776_v2, %v2780_v62 }
0x1653   :  { %v5131_v10 = vpop.eup %5130 }
0x1654   :  { %v2786_v11 = vmul.f32 1.442695, %v2784_v9  ;;  %v2793_v12 = vsel %vm218_vm2, %v5131_v10, 0.0 }
0x1655   :  { %2794 = vadd.xlane.f32.xlu0 %v2793_v12 }
0x1656   :  { %5132 = vpow2.f32 %v2786_v11 }
0x1663   :  { %v5133_v40 = vpop.eup %5132 }
0x1664   :  { %v2790_v15 = vsel %vm218_vm2, %v5133_v40, 0.0 }
0x1665   :  { %2791 = vadd.xlane.f32.xlu0 %v2790_v15 }
0x167b   :  { %2800 = vrot.lane.b32.xlu0 %v5686_v14, %s5212_s20  ;;  %s6031_s20 = smov 48  }
0x167f   :  { %3114 = vrot.lane.b32.xlu0 %v5686_v14, %s6030_s26 }
0x16de   :  { %v2795_v42 = vpop.xlane.xlu0 %2794 }
0x16df   :  { %5134 = vrcp.f32 %v2795_v42 }
0x16ec   :  { %v5135_v18 = vpop.eup %5134 }
0x16ed   :  { %v2799_v19 = vmul.f32 %v5135_v18, %v5131_v10  ;;  %v4493_v10 = vld [vmem:[%s5995_s8 + $0x30] sm:$0xff] }
0x16ee   :  { %v2792_v20 = vpop.xlane.xlu0 %2791 }
0x16ef   :  { %5136 = vrcp.f32 %v2792_v20  ;;  %4929 = vmatmul.mubr.msk.f32.vlgmr.msra.gmra.mxu1 %vm218_vm2, %v2799_v19 }
0x16f0   :  { %4938 = vmatprep.mubr.msk.f32.mxu1 %vm218_vm2, %v2538_v57  ;;  %4937 = vmatpush3.msra.mxu1 %v4491_v16 }
0x16f1   :  { %4946 = vmatprep.subr.mxu1 %v5206_v37 }
0x16f2   :  { %v2801_v22 = vpop.permute.xlu0 %2800 }
0x16f3   :  { %4922 = vmatpush3.msra.mxu0 %v2801_v22  ;;  %4939 = vmatmul.mubr.msk.f32.vlgmr.msra.gmra.mxu1 %vm218_vm2, %v2614_v59 }
0x16f4   :  { %4947 = vmatpush3.xpose.msk.msra.mxu1 %vm218_vm2, %v3195_v21  ;;  %4948 = vmatprep.mubr.msk.f32.mxu1 %vm5207_vm1, %v5206_v37 }
0x16f5   :  { %4956 = vmatprep.subr.mxu1 %v5206_v37  ;;  %4931 = vmatprep.subr.mxu0 %v4492_v27 }
0x16f6   :  { %v3115_v41 = vpop.permute.xlu0 %3114 }
0x16f7   :  { %4949 = vmatmul.mubr.msk.f32.vlgmr.msra.gmra.mxu1 %vm218_vm2, %v3193_v23 }
0x16f8   :  { %4958 = vmatprep.mubr.msk.f32.mxu1 %vm5207_vm1, %v5206_v37 }
0x16fc   :  { %v5137_v24 = vpop.eup %5136 }
0x16fd   :  { %v2798_v25 = vmul.f32 %v5137_v24, %v5133_v40 }
0x16ff   :  { %4924 = vmatmul.mubr.msk.f32.vlgmr.msra.gmra.mxu0 %vm218_vm2, %v2798_v25 }
0x1700   :  { %4932 = vmatpush3.msra.mxu0 %v4492_v27 }
0x1701   :  { %4941 = vmatprep.subr.mxu0 %v5206_v37 }
0x17af   :  { %v2948_v29 = vpop.f32.mrf.mxu1 }
0x17b1   :  { %v4930_v30 = vpop.f32.mrf.mxu1 }
0x17b3   :  { %v5782_v31 = vpop.f32.mrf.mxu1 }
0x17b5   :  { %v5784_v32 = vpop.f32.mrf.mxu1 }
0x17b7   :  { %v3266_v33 = vpop.f32.mrf.mxu1 }
0x17b8   :  { %v3271_v46 = vmul.f32 0.35355338, %v3266_v33 }
0x17b9   :  { %v4950_v4 = vpop.f32.mrf.mxu1 }
0x17ba   :  { %v3273_v34 = vadd.f32 %v5743_v54, %v3271_v46 }
0x17bc   :  { %v3277_v35 = vsel %vm218_vm2, %v3273_v34, -inf }
0x17bd   :  { %3278 = vmax.xlane.f32.xlu1 %v3277_v35 }
0x17bf   :  { %v2872_v36 = vpop.f32.mrf.mxu0 }
0x17c0   :  { %4933 = vmatprep.mubr.msk.f32.mxu0 %vm218_vm2, %v2872_v36 }
0x17c1   :  { %v4925_v38 = vpop.f32.mrf.mxu0  ;;  %4934 = vmatmul.mubr.msk.f32.vlgmr.msra.gmra.mxu0 %vm218_vm2, %v2948_v29 }
0x17c2   :  { %4942 = vmatpush3.xpose.msk.msra.mxu0 %vm218_vm2, %v3117_v17  ;;  %4943 = vmatprep.mubr.msk.f32.mxu0 %vm5207_vm1, %v5206_v37 }
0x17c3   :  { %4951 = vmatprep.subr.mxu0 %v5206_v37 }
0x17c5   :  { %4944 = vmatmul.mubr.msk.f32.vlgmr.msra.gmra.mxu0 %vm218_vm2, %v3115_v41 }
0x17c6   :  { %4953 = vmatprep.mubr.msk.f32.mxu0 %vm5207_vm1, %v5206_v37 }
0x17ce   :  { %3372 = vrot.lane.b32.xlu1 %v5684_v13, %s6031_s20 }
0x17d2   :  { %3533 = vrot.lane.b32.xlu1 %v5686_v14, %s6032_s21 }
0x17d6   :  { %3611 = vrot.lane.b32.xlu1 %v5684_v13, %s6032_s21 }
0x17da   :  { %3609 = vrot.lane.b32.xlu1 %v5684_v13, %s6033_s23 }
0x1846   :  { %v3279_v43 = vpop.xlane.xlu1 %3278 }
0x1847   :  { %v3281_v45 = vsub.f32 %v3273_v34, %v3279_v43 }
0x1849   :  { %v3284_v47 = vmul.f32 1.442695, %v3281_v45 }
0x184a   :  { %v3373_v44 = vpop.permute.xlu1 %3372 }
0x184b   :  { %4957 = vmatpush3.msra.mxu1 %v3373_v44  ;;  %5138 = vpow2.f32 %v3284_v47 }
0x184c   :  { %4966 = vmatprep.subr.mxu1 %v5206_v37 }
0x184e   :  { %v3534_v2 = vpop.permute.xlu1 %3533 }
0x1852   :  { %v3612_v42 = vpop.permute.xlu1 %3611 }
0x1856   :  { %v3610_v19 = vpop.permute.xlu1 %3609 }
0x1858   :  { %v5139_v53 = vpop.eup %5138 }
0x1859   :  { %v3289_v55 = vsel %vm218_vm2, %v5139_v53, 0.0 }
0x1881   :  { %v5806_v48 = vpop.f32.mrf.mxu0 }
0x1882   :  { %v3111_v25 = vadd.f32 %v5782_v31, %v5806_v48 }
0x1883   :  { %v5808_v49 = vpop.f32.mrf.mxu0 }
0x1884   :  { %v3106_v29 = vadd.f32 %v5784_v32, %v5808_v49 }
0x1885   :  { %v3188_v26 = vpop.f32.mrf.mxu0 }
0x1886   :  { %v3270_v50 = vmul.f32 0.35355338, %v3188_v26 }
0x1887   :  { %v4945_v28 = vpop.f32.mrf.mxu0 }
0x1888   :  { %v3272_v51 = vadd.f32 %v5743_v54, %v3270_v50  ;;  %v4494_v28 = vld [vmem:[%s5995_s8 + $0x38] sm:$0xff] }
0x188a   :  { %v3274_v52 = vsel %vm218_vm2, %v3272_v51, -inf }
0x188b   :  { %3275 = vmax.xlane.f32.xlu0 %v3274_v52 }
0x188f   :  { %3290 = vadd.xlane.f32.xlu0 %v3289_v55 }
0x1914   :  { %v3276_v56 = vpop.xlane.xlu0 %3275 }
0x1915   :  { %v3280_v57 = vsub.f32 %v3272_v51, %v3276_v56 }
0x1917   :  { %v3282_v58 = vmul.f32 1.442695, %v3280_v57  ;;  %v4528_v57 = vld [vmem:[%s5996_s9 + $0x1] ss:$0 sm:$0xff] }
0x1918   :  { %v3291_v59 = vpop.xlane.xlu0 %3290 }
0x1919   :  { %5140 = vpow2.f32 %v3282_v58 }
0x191a   :  { %5142 = vrcp.f32 %v3291_v59 }
0x1926   :  { %v5141_v61 = vpop.eup %5140 }
0x1927   :  { %v5143_v63 = vpop.eup %5142  ;;  %v3286_v0 = vsel %vm218_vm2, %v5141_v61, 0.0 }
0x1928   :  { %3287 = vadd.xlane.f32.xlu0 %v3286_v0  ;;  %v3295_v1 = vmul.f32 %v5143_v63, %v5139_v53 }
0x192a   :  { %4959 = vmatmul.mubr.msk.f32.vlgmr.msra.gmra.mxu1 %vm218_vm2, %v3295_v1 }
0x192b   :  { %4967 = vmatpush3.xpose.msk.msra.mxu1 %vm218_vm2, %v3534_v2  ;;  %4968 = vmatprep.mubr.msk.f32.mxu1 %vm5207_vm1, %v5206_v37 }
0x192c   :  { %4976 = vmatprep.subr.mxu1 %v5206_v37 }
0x193e   :  { %3296 = vrot.lane.b32.xlu0 %v5686_v14, %s6031_s20 }
0x1942   :  { %3531 = vrot.lane.b32.xlu0 %v5686_v14, %s6033_s23 }
0x19b1   :  { %v3288_v5 = vpop.xlane.xlu0 %3287 }
0x19b2   :  { %5144 = vrcp.f32 %v3288_v5 }
0x19b5   :  { %v3297_v60 = vpop.permute.xlu0 %3296 }
0x19b6   :  { %4952 = vmatpush3.msra.mxu0 %v3297_v60 }
0x19b7   :  { %4961 = vmatprep.subr.mxu0 %v4493_v10 }
0x19b9   :  { %v3532_v6 = vpop.permute.xlu0 %3531 }
0x19ba   :  { %4969 = vmatmul.mubr.msk.f32.vlgmr.msra.gmra.mxu1 %vm218_vm2, %v3532_v6 }
0x19bb   :  { %4978 = vmatprep.mubr.msk.f32.mxu1 %vm5207_vm1, %v5206_v37 }
0x19bf   :  { %v5145_v7 = vpop.eup %5144 }
0x19c0   :  { %v3294_v8 = vmul.f32 %v5145_v7, %v5141_v61 }
0x19c2   :  { %4954 = vmatmul.mubr.msk.f32.vlgmr.msra.gmra.mxu0 %vm218_vm2, %v3294_v8 }
0x19c3   :  { %4962 = vmatpush3.msra.mxu0 %v4493_v10 }
0x19c4   :  { %4971 = vmatprep.subr.mxu0 %v5206_v37 }
0x19ea   :  { %v3444_v62 = vpop.f32.mrf.mxu1 }
0x19ec   :  { %v4960_v9 = vpop.f32.mrf.mxu1 }
0x1a7a   :  { %v3605_v11 = vpop.f32.mrf.mxu1 }
0x1a7b   :  { %v3687_v12 = vmul.f32 0.35355338, %v3605_v11 }
0x1a7c   :  { %v4970_v40 = vpop.f32.mrf.mxu1 }
0x1a7d   :  { %v3689_v15 = vadd.f32 %v5743_v54, %v3687_v12  ;;  %v4536_v12 = vld [vmem:[%s5999_s12 + $0x38] sm:$0xff]  ;;  %v4535_v40 = vld [vmem:[%s5999_s12 + $0x30] sm:$0xff] }
0x1a7f   :  { %v3691_v16 = vsel %vm218_vm2, %v3689_v15, -inf }
0x1a80   :  { %3692 = vmax.xlane.f32.xlu0 %v3691_v16  ;;  %v4533_v16 = vld [vmem:[%s5999_s12 + $0x20] sm:$0xff] }
0x1a82   :  { %v3368_v17 = vpop.f32.mrf.mxu0 }
0x1a83   :  { %4963 = vmatprep.mubr.msk.f32.mxu0 %vm218_vm2, %v3368_v17 }
0x1a84   :  { %v4955_v18 = vpop.f32.mrf.mxu0  ;;  %4964 = vmatmul.mubr.msk.f32.vlgmr.msra.gmra.mxu0 %vm218_vm2, %v3444_v62 }
0x1a85   :  { %4972 = vmatpush3.xpose.msk.msra.mxu0 %vm218_vm2, %v3612_v42  ;;  %4973 = vmatprep.mubr.msk.f32.mxu0 %vm5207_vm1, %v5206_v37 }
0x1a86   :  { %4981 = vmatprep.subr.mxu0 %v5206_v37 }
0x1a88   :  { %4974 = vmatmul.mubr.msk.f32.vlgmr.msra.gmra.mxu0 %vm218_vm2, %v3610_v19 }
0x1a89   :  { %4983 = vmatprep.mubr.msk.f32.mxu0 %vm5207_vm1, %v5206_v37 }
0x1b09   :  { %v3693_v20 = vpop.xlane.xlu0 %3692 }
0x1b0a   :  { %v3697_v21 = vsub.f32 %v3689_v15, %v3693_v20  ;;  %v4534_v15 = vld [vmem:[%s5999_s12 + $0x28] sm:$0xff] }
0x1b0c   :  { %v3699_v22 = vmul.f32 1.442695, %v3697_v21 }
0x1b0e   :  { %5146 = vpow2.f32 %v3699_v22 }
0x1b1b   :  { %v5147_v23 = vpop.eup %5146 }
0x1b1c   :  { %v3703_v24 = vsel %vm218_vm2, %v5147_v23, 0.0 }
0x1b1d   :  { %3704 = vadd.xlane.f32.xlu0 %v3703_v24 }
0x1b44   :  { %v4965_v27 = vpop.f32.mrf.mxu0 }
0x1b45   :  { %v3530_v30 = vadd.f32 %v4965_v27, %v3111_v25 }
0x1b46   :  { %v3520_v33 = vpop.f32.mrf.mxu0 }
0x1b47   :  { %v3529_v46 = vadd.f32 %v3520_v33, %v3106_v29 }
0x1b48   :  { %v3683_v4 = vpop.f32.mrf.mxu0 }
0x1b49   :  { %v3688_v34 = vmul.f32 0.35355338, %v3683_v4 }
0x1b4a   :  { %v4975_v35 = vpop.f32.mrf.mxu0 }
0x1b4b   :  { %v3690_v36 = vadd.f32 %v5743_v54, %v3688_v34  ;;  %v4558_v34 = vld [vmem:[%s6001_s14 + $0xf8] sm:$0xff]  ;;  %v4557_v35 = vld [vmem:[%s6001_s14 + $0xf0] sm:$0xff] }
0x1b4d   :  { %v3694_v38 = vsel %vm218_vm2, %v3690_v36, -inf }
0x1b4e   :  { %3695 = vmax.xlane.f32.xlu1 %v3694_v38  ;;  %v4555_v38 = vld [vmem:[%s6001_s14 + $0xe0] sm:$0xff] }
0x1b5f   :  { %3789 = vrot.lane.b32.xlu1 %v5684_v13, %s6034_s27 }
0x1ba6   :  { %v3705_v54 = vpop.xlane.xlu0 %3704 }
0x1bd7   :  { %v3696_v41 = vpop.xlane.xlu1 %3695 }
0x1bd8   :  { %v3698_v31 = vsub.f32 %v3690_v36, %v3696_v41  ;;  %v4556_v36 = vld [vmem:[%s6001_s14 + $0xe8] sm:$0xff]  ;;  %v4554_v41 = vld [vmem:[%s6001_s14 + $0xd8] sm:$0xff] }
0x1bda   :  { %v3701_v43 = vmul.f32 1.442695, %v3698_v31  ;;  %v4553_v31 = vld [vmem:[%s6001_s14 + $0xd0] sm:$0xff] }
0x1bdb   :  { %v3790_v44 = vpop.permute.xlu1 %3789 }
0x1bdc   :  { %5148 = vpow2.f32 %v3701_v43  ;;  %4982 = vmatpush3.msra.mxu0 %v3790_v44  ;;  %v4552_v43 = vld [vmem:[%s6001_s14 + $0xc8] sm:$0xff]  ;;  %v4551_v44 = vld [vmem:[%s6001_s14 + $0xc0] sm:$0xff] }
0x1bdd   :  { %5150 = vrcp.f32 %v3705_v54  ;;  %4991 = vmatprep.subr.mxu0 %v4536_v12  ;;  %v4548_v54 = vld [vmem:[%s6001_s14 + $0xa8] sm:$0xff] }
0x1be9   :  { %v5149_v32 = vpop.eup %5148 }
0x1bea   :  { %v3706_v45 = vsel %vm218_vm2, %v5149_v32, 0.0  ;;  %v5151_v48 = vpop.eup %5150 }
0x1beb   :  { %3707 = vadd.xlane.f32.xlu0 %v3706_v45  ;;  %v3711_v13 = vmul.f32 %v5151_v48, %v5147_v23  ;;  %v4531_v23 = vld [vmem:[%s5997_s10 + $0x1] ss:$0 sm:$0xff]  ;;  %v4549_v45 = vld [vmem:[%s6001_s14 + $0xb0] sm:$0xff]  ;;  %v4546_v48 = vld [vmem:[%s6001_s14 + $0x98] sm:$0xff] }
0x1c01   :  { %3713 = vrot.lane.b32.xlu0 %v5686_v14, %s6034_s27 }
0x1c74   :  { %v3708_v47 = vpop.xlane.xlu0 %3707 }
0x1c75   :  { %5152 = vrcp.f32 %v3708_v47  ;;  %v4547_v47 = vld [vmem:[%s6001_s14 + $0xa0] sm:$0xff] }
0x1c78   :  { %v3714_v49 = vpop.permute.xlu0 %3713 }
0x1c79   :  { %4977 = vmatpush3.msra.mxu1 %v3714_v49  ;;  %v4545_v49 = vld [vmem:[%s6001_s14 + $0x90] sm:$0xff] }
0x1c7a   :  { %4979 = vmatmul.mubr.msk.f32.vlgmr.msra.gmra.mxu1 %vm218_vm2, %v3711_v13  ;;  %4986 = vmatprep.subr.mxu1 %v4494_v28  ;;  %v4544_v13 = vld [vmem:[%s6001_s14 + $0x88] sm:$0xff] }
0x1c7b   :  { %4987 = vmatpush3.msra.mxu1 %v4494_v28 }
0x1c7c   :  { %5002 = vmatprep.subr.mxu1 %v4558_v34 }
0x1c82   :  { %v5153_v26 = vpop.eup %5152 }
0x1c83   :  { %v3712_v50 = vmul.f32 %v5153_v26, %v5149_v32  ;;  %v4550_v32 = vld [vmem:[%s6001_s14 + $0xb8] sm:$0xff]  ;;  %v4543_v26 = vld [vmem:[%s6001_s14 + $0x80] sm:$0xff]  ;;  %s4224_s14 = sld [smem:[#allocation3]] }
0x1c85   :  { %4984 = vmatmul.mubr.msk.f32.vlgmr.msra.gmra.mxu0 %vm218_vm2, %v3712_v50  ;;  %v4538_v50 = vld [vmem:[%s6029_s13 + $0x1] ss:$0 sm:$0xff]  ;;  %s4561_s13 = sld [smem:[#allocation3 + $0x1]] }
0x1c86   :  { %4992 = vmatpush3.msra.mxu0 %v4536_v12  ;;  %v4560_v12 = vld [vmem:[%s6002_s15 + $0x1] ss:$0 sm:$0xff] }
0x1c87   :  { %4993 = vmatprep.subr.mxu0 %v4535_v40 }
0x1c88   :  { %4994 = vmatpush3.msra.mxu0 %v4535_v40 }
0x1c89   :  { %4995 = vmatprep.subr.mxu0 %v4534_v15 }
0x1c8a   :  { %4996 = vmatpush3.msra.mxu0 %v4534_v15 }
0x1c8b   :  { %4997 = vmatprep.subr.mxu0 %v4533_v16 }
0x1c8c   :  { %4998 = vmatpush3.msra.mxu0 %v4533_v16 }
0x1c8d   :  { %5037 = vmatprep.subr.mxu0 %v5206_v37 }
0x1d3a   :  { %v3785_v14 = vpop.f32.mrf.mxu1 }
0x1d3b   :  { %4988 = vmatprep.mubr.msk.f32.mxu1 %vm218_vm2, %v3785_v14 }
0x1d3c   :  { %v4980_v51 = vpop.f32.mrf.mxu1 }
0x1d45   :  { %v3861_v52 = vpop.f32.mrf.mxu0 }
0x1d46   :  { %4989 = vmatmul.mubr.msk.f32.vlgmr.msra.gmra.mxu1 %vm218_vm2, %v3861_v52 }
0x1d47   :  { %v4985_v53 = vpop.f32.mrf.mxu0  ;;  %5003 = vmatpush3.msra.mxu1 %v4558_v34 }
0x1d48   :  { %5004 = vmatprep.subr.mxu1 %v4557_v35 }
0x1d49   :  { %5005 = vmatpush3.msra.mxu1 %v4557_v35 }
0x1d4a   :  { %5006 = vmatprep.subr.mxu1 %v4556_v36 }
0x1d4b   :  { %5007 = vmatpush3.msra.mxu1 %v4556_v36 }
0x1d4c   :  { %5008 = vmatprep.subr.mxu1 %v4555_v38 }
0x1d4d   :  { %5009 = vmatpush3.msra.mxu1 %v4555_v38 }
0x1d4e   :  { %5010 = vmatprep.subr.mxu1 %v4554_v41 }
0x1d4f   :  { %5011 = vmatpush3.msra.mxu1 %v4554_v41  ;;  %v4564_v41 = vld [vmem:[%s6003_s16] ss:$0 sm:$0xff] }
0x1d50   :  { %5012 = vmatprep.subr.mxu1 %v4553_v31 }
0x1d51   :  { %5013 = vmatpush3.msra.mxu1 %v4553_v31 }
0x1d52   :  { %5014 = vmatprep.subr.mxu1 %v4552_v43 }
0x1d53   :  { %5015 = vmatpush3.msra.mxu1 %v4552_v43  ;;  %v4565_v43 = vld [vmem:[%s6004_s17] ss:$0 sm:$0xff] }
0x1d54   :  { %5016 = vmatprep.subr.mxu1 %v4551_v44 }
0x1d55   :  { %5017 = vmatpush3.msra.mxu1 %v4551_v44 }
0x1d56   :  { %5018 = vmatprep.subr.mxu1 %v4550_v32 }
0x1d57   :  { %5019 = vmatpush3.msra.mxu1 %v4550_v32 }
0x1d58   :  { %5020 = vmatprep.subr.mxu1 %v4549_v45 }
0x1d59   :  { %5021 = vmatpush3.msra.mxu1 %v4549_v45 }
0x1d5a   :  { %5022 = vmatprep.subr.mxu1 %v4548_v54 }
0x1d5b   :  { %5023 = vmatpush3.msra.mxu1 %v4548_v54 }
0x1d5c   :  { %5024 = vmatprep.subr.mxu1 %v4547_v47 }
0x1d5d   :  { %5025 = vmatpush3.msra.mxu1 %v4547_v47 }
0x1d5e   :  { %5026 = vmatprep.subr.mxu1 %v4546_v48 }
0x1d5f   :  { %5027 = vmatpush3.msra.mxu1 %v4546_v48 }
0x1d60   :  { %5028 = vmatprep.subr.mxu1 %v4545_v49 }
0x1d61   :  { %5029 = vmatpush3.msra.mxu1 %v4545_v49 }
0x1d62   :  { %5030 = vmatprep.subr.mxu1 %v4544_v13 }
0x1d63   :  { %5031 = vmatpush3.msra.mxu1 %v4544_v13 }
0x1d64   :  { %5032 = vmatprep.subr.mxu1 %v4543_v26 }
0x1d65   :  { %5033 = vmatpush3.msra.mxu1 %v4543_v26 }
0x1e06   :  { %v4990_v55 = vpop.f32.mrf.mxu1 }
0x1e07   :  { %v3947_v56 = vadd.f32 %v4990_v55, %v3530_v30  ;;  %v4532_v30 = vld [vmem:[%s5998_s11 + $0x1] ss:$0 sm:$0xff] }
0x1e08   :  { %v3937_v58 = vpop.f32.mrf.mxu1 }
0x1e09   :  { %v3949_v59 = vadd.f32 %v3947_v56, %v5645_v3  ;;  %v3946_v61 = vadd.f32 %v3937_v58, %v3529_v46 }
0x1e0b   :  { %v5865_v63 = vadd.f32 %v4528_v57, %v3949_v59  ;;  %v3948_v0 = vadd.f32 %v3946_v61, %v5648_v39 }
0x1e0d   :  { %v5868_v1 = vadd.f32 %v4528_v57, %v3948_v0  ;;  %v3967_v2 = vsel %vm75_vm0, %v5865_v63, 0.0 }
0x1e0e   :  { %3968 = vadd.xlane.f32.xlu0 %v3967_v2 }
0x1e0f   :  { %v3964_v5 = vsel %vm75_vm0, %v5868_v1, 0.0 }
0x1e10   :  { %3965 = vadd.xlane.f32.xlu1 %v3964_v5 }
0x1e97   :  { %v3969_v60 = vpop.xlane.xlu0 %3968 }
0x1e98   :  { %v3971_v6 = vmul.f32 0.03125, %v3969_v60 }
0x1e99   :  { %v3966_v7 = vpop.xlane.xlu1 %3965 }
0x1e9a   :  { %v3973_v3 = vsub.f32 %v5865_v63, %v3971_v6  ;;  %v3970_v8 = vmul.f32 0.03125, %v3966_v7  ;;  %v4218_v7 = vlaneseq }
0x1e9c   :  { %v3972_v62 = vsub.f32 %v5868_v1, %v3970_v8  ;;  %v3975_v9 = vmul.f32 %v3973_v3, %v3973_v3  ;;  %v4225_v8 = vstv %s4224_s14  ;;  %v4219_v40 = vand.u32 127, %v4218_v7 }
0x1e9e   :  { %v3979_v39 = vsel %vm75_vm0, %v3975_v9, 0.0  ;;  %v3974_v10 = vmul.f32 %v3972_v62, %v3972_v62 }
0x1e9f   :  { %3980 = vadd.xlane.f32.xlu1 %v3979_v39  ;;  %v4230_v39 = vstv %s4561_s13 }
0x1ea0   :  { %v3976_v11 = vsel %vm75_vm0, %v3974_v10, 0.0 }
0x1ea1   :  { %3977 = vadd.xlane.f32.xlu0 %v3976_v11 }
0x1f28   :  { %v3981_v42 = vpop.xlane.xlu1 %3980 }
0x1f29   :  { %v3983_v17 = vmul.f32 0.03125, %v3981_v42 }
0x1f2a   :  { %v3978_v18 = vpop.xlane.xlu0 %3977 }
0x1f2b   :  { %v3985_v19 = vadd.f32 1e-05, %v3983_v17  ;;  %v3982_v20 = vmul.f32 0.03125, %v3978_v18 }
0x1f2d   :  { %5154 = vrsqrt.f32 %v3985_v19  ;;  %v3984_v21 = vadd.f32 1e-05, %v3982_v20 }
0x1f2f   :  { %5156 = vrsqrt.f32 %v3984_v21 }
0x1f3a   :  { %v5155_v22 = vpop.eup %5154 }
0x1f3b   :  { %v3989_v24 = vmul.f32 %v5155_v22, %v3973_v3  ;;  %v4221_v3 = vshrl.u32 %v4218_v7, 7 }
0x1f3c   :  { %v5157_v25 = vpop.eup %5156 }
0x1f3d   :  { %v3988_v27 = vmul.f32 %v5157_v25, %v3972_v62  ;;  %v3997_v29 = vmul.f32 %v4531_v23, %v3989_v24  ;;  %vm4223_vm3 = vcmp.eq.s32.totalorder %v4221_v3, 0  ;;  %v4222_v62 = vmul.u32 8, %v4221_v3 }
0x1f3e   :  { %v4226_v9 = vsel %vm4223_vm3, %v4225_v8, 0  ;;  %vm4228_vm4 = vcmp.eq.s32.totalorder %v4221_v3, 1 }
0x1f3f   :  { %v3996_v33 = vmul.f32 %v4531_v23, %v3988_v27  ;;  %v4005_v4 = vadd.f32 %v4532_v30, %v3997_v29  ;;  %v4227_v10 = vadd.s32 %v4226_v9, %v4222_v62  ;;  %v4231_v11 = vsel %vm4228_vm4, %v4230_v39, 0 }
0x1f41   :  { %v4004_v46 = vadd.f32 %v4532_v30, %v3996_v33  ;;  %v4232_v15 = vadd.s32 %v4231_v11, %v4227_v10  ;;  %v4343_v30 = vld [vmem:[%s6005_s18 + $0x18] sm:$0xff]  ;;  %v4342_v33 = vld [vmem:[%s6005_s18 + $0x10] sm:$0xff] }
0x1f43   :  { %4999 = vmatprep.mubr.msk.f32.mxu0 %vm75_vm0, %v4004_v46  ;;  %vm4233_vm5 = vcmp.eq.s32.totalorder %v4219_v40, %v4232_v15  ;;  %v4341_v46 = vld [vmem:[%s6005_s18 + $0x8] sm:$0xff] }
0x1f44   :  { %5000 = vmatmul.mubr.msk.f32.vlgmr.msra.gmra.mxu0 %vm75_vm0, %v4005_v4  ;;  %v4562_v21 = vsel %vm4233_vm5, 1.0, %v5206_v37  ;;  %v4340_v4 = vld [vmem:[%s6005_s18] sm:$0xff]  ;;  %s5219_s18 = smov [#allocation4]  }
0x1f45   :  { %5041 = vmatprep.mubr.msk.f32.mxu0 %vm5207_vm1, %v5206_v37  ;;  %s4425_s30 = sshll.u32 %s5219_s18, 4  ;;  %s4426_s30 = int_to_ptr.vmem [resolvable:$true] %s4425_s30 }
0x1f46   :  { %s5181_s20 = scalar_lea.vmem %s4426_s30, 32  ;;  %p5186_p6 = scmp.lt.s32.totalorder %s4426_s30, %s4426_s30 }
0x1f47   :  { %p5182_p5 = scmp.ne.s32.totalorder %s4426_s30, %s5181_s20  ;;  %p5187_p7 = scmp.lt.s32.totalorder %s5181_s20, %s5181_s20 }
0x1f49   :  { %p5188_p8 = por %p5187_p7, %p5186_p6 }
0x1f4b   :  { %p5189_p9 = pnand %p5188_p8, %p5182_p5 }
0x2004   :  { %v5001_v28 = vpop.f32.mrf.mxu0 }
0x2005   :  { %v4097_v14 = vadd.f32 %v5001_v28, %v4538_v50 }
0x2006   :  { %v4091_v51 = vpop.f32.mrf.mxu0 }
0x2007   :  { %v4542_v52 = vmul.f32 -1.702, %v4097_v14  ;;  %v4092_v53 = vadd.f32 %v4538_v50, %v4091_v51 }
0x2009   :  { %v4106_v55 = vmul.f32 1.442695, %v4542_v52  ;;  %v4541_v56 = vmul.f32 -1.702, %v4092_v53 }
0x200b   :  { %5158 = vpow2.f32 %v4106_v55  ;;  %v4104_v57 = vmul.f32 1.442695, %v4541_v56 }
0x200d   :  { %5160 = vpow2.f32 %v4104_v57 }
0x2018   :  { %v5159_v58 = vpop.eup %5158 }
0x2019   :  { %v4109_v59 = vadd.f32 1.0, %v5159_v58 }
0x201a   :  { %v5161_v61 = vpop.eup %5160 }
0x201b   :  { %v4108_v0 = vadd.f32 1.0, %v5161_v61  ;;  %5162 = vrcp.f32 %v4109_v59 }
0x201d   :  { %5164 = vrcp.f32 %v4108_v0 }
0x2028   :  { %v5163_v2 = vpop.eup %5162 }
0x2029   :  { %v4115_v6 = vmul.f32 %v5163_v2, %v4097_v14 }
0x202a   :  { %v5165_v5 = vpop.eup %5164 }
0x202b   :  { %v4114_v60 = vmul.f32 %v5165_v5, %v4092_v53 }
0x202d   :  { %5034 = vmatprep.mubr.f32.mxu1 %v4114_v60 }
0x202e   :  { %5035 = vmatmul.mubr.f32.vlgmr.msra.gmra.mxu1 %v4115_v6 }
0x20ee   :  { %v5036_v16 = vpop.f32.mrf.mxu1 }
0x20ef   :  { %v4213_v42 = vadd.f32 %v5036_v16, %v4560_v12 }
0x20f0   :  { %v4207_v17 = vpop.f32.mrf.mxu1 }
0x20f1   :  { %v4217_v18 = vadd.f32 %v4213_v42, %v5865_v63  ;;  %v4208_v19 = vadd.f32 %v4560_v12, %v4207_v17 }
0x20f3   :  { %v4216_v20 = vadd.f32 %v4208_v19, %v5868_v1  ;;  %5038 = vmatpush3.msra.mxu0 %v4217_v18 }
0x20f4   :  { %5039 = vmatprep.subr.mxu0 %v5206_v37 }
0x20f5   :  { %5040 = vmatpush3.msra.mxu0 %v4216_v20 }
0x20f6   :  { %5042 = vmatmul.mubr.msk.f32.vlgmr.msra.gmra.mxu0 %vm4236_vm6, %v4562_v21  ;;  %5044 = vmatprep.subr.mxu0 %v5206_v37 }
0x20f7   :  { %5052 = vmatprep.mubr.msk.f32.mxu0 %vm5207_vm1, %v5206_v37  ;;  %5045 = vmatpush3.msra.mxu0 %v4343_v30 }
0x20f8   :  { %5046 = vmatprep.subr.mxu0 %v5206_v37 }
0x20f9   :  { %5047 = vmatpush3.msra.mxu0 %v4342_v33 }
0x20fa   :  { %5048 = vmatprep.subr.mxu0 %v5206_v37 }
0x20fb   :  { %5049 = vmatpush3.msra.mxu0 %v4341_v46 }
0x20fc   :  { %5050 = vmatprep.subr.mxu0 %v5206_v37 }
0x20fd   :  { %5051 = vmatpush3.msra.mxu0 %v4340_v4 }
0x21b6   :  { %v4306_v22 = vpop.f32.mrf.mxu0 }
0x21b7   :  { %v4313_v23 = vsel %vm4312_vm7, %v4306_v22, 0.0 }
0x21b8   :  { %4314 = vadd.xlane.f32.xlu0 %v4313_v23  ;;  %v5043_v63 = vpop.f32.mrf.mxu0 }
0x2241   :  { %v4315_v24 = vpop.xlane.xlu0 %4314 }
0x2242   :  { %v4316_v1 = vmul.f32 0.03125, %v4315_v24 }
0x2244   :  { %v4317_v25 = vsub.f32 %v4306_v22, %v4316_v1 }
0x2246   :  { %v4318_v27 = vmul.f32 %v4317_v25, %v4317_v25 }
0x2248   :  { %v4319_v29 = vsel %vm4312_vm7, %v4318_v27, 0.0 }
0x2249   :  { %4320 = vadd.xlane.f32.xlu1 %v4319_v29 }
0x22d2   :  { %v4321_v34 = vpop.xlane.xlu1 %4320 }
0x22d3   :  { %v4322_v35 = vmul.f32 0.03125, %v4321_v34 }
0x22d5   :  { %v4323_v36 = vadd.f32 1e-05, %v4322_v35 }
0x22d7   :  { %5166 = vrsqrt.f32 %v4323_v36 }
0x22e4   :  { %v5167_v38 = vpop.eup %5166 }
0x22e5   :  { %v4325_v31 = vmul.f32 %v5167_v38, %v4317_v25 }
0x22e7   :  { %v4332_v44 = vmul.f32 %v4564_v41, %v4325_v31 }
0x22e9   :  { %v4339_v32 = vadd.f32 %v4565_v43, %v4332_v44 }
0x22eb   :  { %5053 = vmatmul.mubr.msk.f32.vlgmr.msra.gmra.mxu0 %vm75_vm0, %v4339_v32 }
0x23ab   :  { %v4413_v37 = vpop.f32.mrf.mxu0 }
0x23ac   :  { %4418 = vst.msk [vmem:[#allocation4] sm:$0x3] %vm4417_vm8, %v4413_v37 }
0x23ad   :  { %v5054_v45 = vpop.f32.mrf.mxu0 }
0x23ae   :  { %5192 = shalt.err (!%p5189_p9)
}
0x23af   :  { %4428 = dma.vmem_to_hbm [thread:$0]  %s4426_s30, 32, %s6006_s19, [#allocation5]  }
0x23b0   :  { %5203 = dma.done.wait [#allocation5], 32  }
0x23b1   :  { %5204 = vsyncadd [#allocation5], 4294967264 }
0x23b2   :  { %4432 = vsyncpa [#allocation5], 1 }

</bundles_post_ra>
